<compile_context>
chip_gen: v5e
topology: v5e:2x2
jax: 0.10.0
libtpu: 0.0.40
codegen_flags: <defaults>
</compile_context>

<pallas_src>
import math

import jax
import jax.numpy as jnp
from jax.experimental import pallas as pl
from jax.experimental.pallas import tpu as pltpu

# ----------------------- small config (scaled-down ModelArgs) -----------------------
VOCAB = 128           # lane-dense logits (multiple of 128)
EMBED = 32            # embeddings_dims
SEQ = 16              # block_size (power of two -> cheap in-kernel causal mask)
BATCH = 2
N_LAYERS = 2          # no_of_decoder_layers
N_HEADS = 4           # no_of_heads
N_KV_HEADS = 2        # no_kv_heads
N_Q_HEADS = N_HEADS // N_KV_HEADS     # query heads per MQA block
HIDDEN = 4 * EMBED
RMS_EPS = 1e-6
SQRT_E = math.sqrt(float(EMBED))
INV_SQRT2 = 0.7071067811865476

assert SEQ & (SEQ - 1) == 0, "SEQ must be a power of two for the in-kernel mask"


# ===================================== kernel =======================================

def _erf_f32(x):
    # f32 erf rational approximation (same algorithm XLA/Eigen use for f32 erf),
    # built from mul/add/clip; the final divide goes to the EUP via pl.reciprocal.
    a1, a3, a5 = 1.128379143519084, 0.18520832239976145, 0.050955695062380861
    a7, a9 = 0.0034082910107109506, 0.00022905065861350646
    b0, b2, b4 = 1.0, 0.49746925110067538, 0.11098505178285362
    b6, b8 = 0.014070470171167667, 0.0010179625278914885
    b10, b12 = 2.3547966471313185e-05, -1.1791602954361697e-07
    x = jnp.clip(x, -3.832506856900711, 3.832506856900711)
    x2 = x * x
    p = (((a9 * x2 + a7) * x2 + a5) * x2 + a3) * x2 + a1
    q = (((((b12 * x2 + b10) * x2 + b8) * x2 + b6) * x2 + b4) * x2 + b2) * x2 + b0
    return (x * p) * pl.reciprocal(q, approx=True)


def _rms(v, w):
    ms = jnp.mean(v * v, axis=-1, keepdims=True)
    return v * jax.lax.rsqrt(ms + RMS_EPS) * w


def _gemma_kernel(x_emb_ref, trig_ref, wkvq_ref, wo_ref, w1_ref, b1_ref,
                  wg12_ref, g3_ref, w2_ref, b2_ref, nw_ref, wout_ref, bout_ref,
                  out_ref, x_ref):
    E, H, S = EMBED, N_Q_HEADS, SEQ
    l = pl.program_id(1)

    # ---- load the embedding block into the resident residual-stream scratch ----
    @pl.when(l == 0)
    def _():
        x_ref[...] = x_emb_ref[...].astype(jnp.float32)

    x = x_ref[...]                                   # (S, E)
    trig = trig_ref[...]                             # (H*S, E) = [cos | sin] per row

    def rot(z):                                      # half-split rotary
        half = E // 2
        n = z.shape[0]
        zf, zs = z[:, :half], z[:, half:]
        c, s = trig[:n, :half], trig[:n, half:E]
        return jnp.concatenate([c * (zf + zs), s * (zs - zf)], axis=-1)

    # ----------------------- MQA: one fused [k|v|q0|q1] matmul -----------------------
    kvq = jnp.dot(x, wkvq_ref[...], preferred_element_type=jnp.float32)   # (S,(2+H)E)
    k = kvq[:, 0:E]
    v = kvq[:, E:2 * E]
    q_all = jnp.concatenate([kvq[:, (2 + h) * E:(3 + h) * E] for h in range(H)],
                            axis=0)                                       # (H*S, E)
    k_rot = rot(k)                                                        # (S, E)
    q_rot = rot(q_all)                                                    # (H*S, E)

    # batched causal attention over all heads; 1/sqrt(E) already folded into Wq
    scores = jax.lax.dot_general(q_rot, k_rot, (((1,), (1,)), ((), ())),
                                 preferred_element_type=jnp.float32)      # (H*S, S)
    row = jax.lax.broadcasted_iota(jnp.int32, (H * S, S), 0)
    col = jax.lax.broadcasted_iota(jnp.int32, (H * S, S), 1)
    pos = jnp.bitwise_and(row, S - 1)               # row position within each head
    scores = jnp.where(col <= pos, scores, -jnp.inf)
    m = jnp.max(scores, axis=-1, keepdims=True)
    e = jnp.exp(scores - m)
    p = e * pl.reciprocal(jnp.sum(e, axis=-1, keepdims=True), approx=True)
    attn = jnp.dot(p, v, preferred_element_type=jnp.float32)              # (H*S, E)

    # concat-over-heads @ Wo  ==  sum_h attn_h @ Wo[h*E:(h+1)*E]
    wo = wo_ref[...]                                                      # (H*E, E)
    attn_out = jnp.zeros((S, E), jnp.float32)
    for h in range(H):
        attn_out = attn_out + jnp.dot(attn[h * S:(h + 1) * S, :],
                                      wo[h * E:(h + 1) * E, :],
                                      preferred_element_type=jnp.float32)

    nw = nw_ref[...]
    x = _rms(x + attn_out, nw)

    # ------------------------------ FFN + GeGLU --------------------------------
    h1 = jnp.dot(x, w1_ref[...], preferred_element_type=jnp.float32) + b1_ref[...]
    ag = jnp.dot(h1, wg12_ref[...], preferred_element_type=jnp.float32)   # (S, 8E)
    a, g = ag[:, :HIDDEN], ag[:, HIDDEN:]
    gated = (0.5 * a * (1.0 + _erf_f32(a * INV_SQRT2))) * g               # gelu(a)*g
    h3 = jnp.dot(gated, g3_ref[...], preferred_element_type=jnp.float32)  # (S, 4E)
    ffn_out = jnp.dot(h3, w2_ref[...], preferred_element_type=jnp.float32) + b2_ref[...]
    x = _rms(x + ffn_out, nw)

    x_ref[...] = x

    # ----------------------- final linear on the last layer -----------------------
    @pl.when(l == pl.num_programs(1) - 1)
    def _():
        logits = (jnp.dot(x, wout_ref[...], preferred_element_type=jnp.float32)
                  + bout_ref[...])
        out_ref[...] = logits.astype(out_ref.dtype)


# =============================== pallas_call wrapper ================================

def _gemma_pallas_call(B):
    def layer_spec(r, c):          # per-layer stacked weight: pick layer l
        return pl.BlockSpec((None, r, c), lambda b, l: (l, 0, 0))

    def const_spec(shape):         # grid-invariant full-array input (DMA'd once)
        n = len(shape)
        return pl.BlockSpec(shape, lambda b, l: (0,) * n)

    return pl.pallas_call(
        _gemma_kernel,
        grid=(B, N_LAYERS),
        in_specs=[
            pl.BlockSpec((None, SEQ, EMBED), lambda b, l: (b, 0, 0)),   # x_emb
            const_spec((N_Q_HEADS * SEQ, EMBED)),                       # trig (cos|sin)
            layer_spec(EMBED, (2 + N_Q_HEADS) * EMBED),                 # [wk|wv|wq...]
            layer_spec(N_Q_HEADS * EMBED, EMBED),                       # wo
            layer_spec(EMBED, HIDDEN),                                  # w1
            layer_spec(1, HIDDEN),                                      # b1
            layer_spec(HIDDEN, 2 * HIDDEN),                             # [g1|g2]
            layer_spec(HIDDEN, HIDDEN),                                 # g3
            layer_spec(HIDDEN, EMBED),                                  # w2
            layer_spec(1, EMBED),                                       # b2
            layer_spec(1, EMBED),                                       # norm weight
            const_spec((EMBED, VOCAB)),                                 # w_out
            const_spec((1, VOCAB)),                                     # b_out
        ],
        out_specs=pl.BlockSpec((None, SEQ, VOCAB), lambda b, l: (b, 0, 0)),
        out_shape=jax.ShapeDtypeStruct((B, SEQ, VOCAB), jnp.float32),
        scratch_shapes=[pltpu.VMEM((SEQ, EMBED), jnp.float32)],         # residual x
        compiler_params=pltpu.CompilerParams(
            dimension_semantics=("parallel", "arbitrary")),
    )


@jax.jit
def gemma_forward(params, tokens):
    B, S = tokens.shape
    assert S == SEQ
    x_emb = params["emb"][tokens]            # embedding gather (XLA glue); dropout=id
    return _gemma_pallas_call(B)(
        x_emb, params["trig"], params["wkvq"], params["wo"], params["w1"],
        params["b1"], params["wg12"], params["g3"], params["w2"], params["b2"],
        params["norm_w"], params["w_out"], params["b_out"])


# ================================ parameter creation ================================

def rotary_trig(seq, dim):
    # RotaryEmbeddings.init_matrix: theta = 10000 ** (-2*(p-1)/dim); angle = p*theta
    p = jnp.arange(seq, dtype=jnp.float32)
    theta = jnp.power(10000.0, -2.0 * (p - 1.0) / float(dim))
    ang = p * theta
    half = dim // 2
    cs = jnp.concatenate(
        [jnp.broadcast_to(jnp.cos(ang)[:, None], (seq, half)),
         jnp.broadcast_to(jnp.sin(ang)[:, None], (seq, half))], axis=1)   # (S, E)
    return jnp.tile(cs, (N_Q_HEADS, 1))      # (H*S, E), head-major rows


def init_params(key):
    keys = iter(jax.random.split(key, 512))

    def lin_w(in_f, out_f):
        bound = 1.0 / math.sqrt(in_f)
        return jax.random.uniform(next(keys), (in_f, out_f), jnp.float32, -bound, bound)

    def lin_b(in_f, out_f):
        bound = 1.0 / math.sqrt(in_f)
        return jax.random.uniform(next(keys), (1, out_f), jnp.float32, -bound, bound)

    # permutation: interleaved (even/odd) rotary pairs -> half-split layout
    perm = jnp.concatenate([jnp.arange(0, EMBED, 2), jnp.arange(1, EMBED, 2)])

    wkvq, wo, w1, b1, wg12, g3, w2, b2, nw = ([] for _ in range(9))
    for _ in range(N_LAYERS):
        wk = lin_w(EMBED, EMBED)
        wv = lin_w(EMBED, EMBED)
        wqs = [lin_w(EMBED, EMBED) for _ in range(N_Q_HEADS)]
        # fuse [k | v | q0 | q1]; permute k/q columns to half-split; fold 1/sqrt(E)
        wkvq.append(jnp.concatenate(
            [wk[:, perm], wv] + [wq[:, perm] / SQRT_E for wq in wqs], axis=1))
        wo.append(lin_w(N_Q_HEADS * EMBED, EMBED))
        w1.append(lin_w(EMBED, HIDDEN)); b1.append(lin_b(EMBED, HIDDEN))
        g1 = lin_w(HIDDEN, HIDDEN); g2 = lin_w(HIDDEN, HIDDEN)
        wg12.append(jnp.concatenate([g1, g2], axis=1))
        g3.append(lin_w(HIDDEN, HIDDEN))
        w2.append(lin_w(HIDDEN, EMBED)); b2.append(lin_b(HIDDEN, EMBED))
        nw.append(jnp.ones((1, EMBED), jnp.float32))     # RMSNorm weight (ones)

    return {
        "emb": jax.random.normal(next(keys), (VOCAB, EMBED), jnp.float32),
        "trig": rotary_trig(SEQ, EMBED),
        "wkvq": jnp.stack(wkvq), "wo": jnp.stack(wo),
        "w1": jnp.stack(w1), "b1": jnp.stack(b1),
        "wg12": jnp.stack(wg12), "g3": jnp.stack(g3),
        "w2": jnp.stack(w2), "b2": jnp.stack(b2),
        "norm_w": jnp.stack(nw),
        "w_out": lin_w(EMBED, VOCAB), "b_out": lin_b(EMBED, VOCAB),
    }


# ======================================= main =======================================

if __name__ == "__main__":
    key = jax.random.PRNGKey(0)
    pkey, tkey = jax.random.split(key)
    params = init_params(pkey)
    tokens = jax.random.randint(tkey, (BATCH, SEQ), 0, VOCAB, dtype=jnp.int32)

    logits = gemma_forward(params, tokens)
    jax.block_until_ready(logits)
    assert logits.shape == (BATCH, SEQ, VOCAB)
    assert bool(jnp.all(jnp.isfinite(logits)))
    print("KERNEL_OK")
</pallas_src>

<mosaic_0001>
module attributes {stable_mosaic.version = 11 : i64} {
  func.func @_gemma_kernel(%arg0: i32, %arg1: i32, %arg2: memref<1x16x32xf32, #tpu.memory_space<vmem>>, %arg3: memref<32x32xf32, #tpu.memory_space<vmem>>, %arg4: memref<1x32x128xf32, #tpu.memory_space<vmem>>, %arg5: memref<1x64x32xf32, #tpu.memory_space<vmem>>, %arg6: memref<1x32x128xf32, #tpu.memory_space<vmem>>, %arg7: memref<1x1x128xf32, #tpu.memory_space<vmem>>, %arg8: memref<1x128x256xf32, #tpu.memory_space<vmem>>, %arg9: memref<1x128x128xf32, #tpu.memory_space<vmem>>, %arg10: memref<1x128x32xf32, #tpu.memory_space<vmem>>, %arg11: memref<1x1x32xf32, #tpu.memory_space<vmem>>, %arg12: memref<1x1x32xf32, #tpu.memory_space<vmem>>, %arg13: memref<32x128xf32, #tpu.memory_space<vmem>>, %arg14: memref<1x128xf32, #tpu.memory_space<vmem>>, %arg15: memref<1x16x128xf32, #tpu.memory_space<vmem>>, %arg16: memref<16x32xf32, #tpu.memory_space<vmem>>) attributes {dimension_semantics = [#tpu.dimension_semantics<parallel>, #tpu.dimension_semantics<arbitrary>], iteration_bounds = array<i64: 2, 2>, scalar_prefetch = 0 : i64, scratch_operands = 1 : i64, tpu.core_type = #tpu.core_type<tc>, window_params = [{transform_indices = @transform_0, window_bounds = array<i64: 1, 16, 32>}, {pipeline_mode = #tpu.pipeline_mode<synchronous>, transform_indices = @transform_1, window_bounds = array<i64: 32, 32>}, {transform_indices = @transform_2, window_bounds = array<i64: 1, 32, 128>}, {transform_indices = @transform_3, window_bounds = array<i64: 1, 64, 32>}, {transform_indices = @transform_4, window_bounds = array<i64: 1, 32, 128>}, {transform_indices = @transform_5, window_bounds = array<i64: 1, 1, 128>}, {transform_indices = @transform_6, window_bounds = array<i64: 1, 128, 256>}, {transform_indices = @transform_7, window_bounds = array<i64: 1, 128, 128>}, {transform_indices = @transform_8, window_bounds = array<i64: 1, 128, 32>}, {transform_indices = @transform_9, window_bounds = array<i64: 1, 1, 32>}, {transform_indices = @transform_10, window_bounds = array<i64: 1, 1, 32>}, {pipeline_mode = #tpu.pipeline_mode<synchronous>, transform_indices = @transform_11, window_bounds = array<i64: 32, 128>}, {pipeline_mode = #tpu.pipeline_mode<synchronous>, transform_indices = @transform_12, window_bounds = array<i64: 1, 128>}, {transform_indices = @transform_13, window_bounds = array<i64: 1, 16, 128>}]} {
    %c0_i32 = arith.constant 0 : i32
    %0 = arith.cmpi eq, %arg1, %c0_i32 : i32
    %1 = arith.extui %0 : i1 to i32
    %c0_i32_0 = arith.constant 0 : i32
    %2 = arith.cmpi ne, %1, %c0_i32_0 : i32
    scf.if %2 {
      %c0_69 = arith.constant 0 : index
      %c0_70 = arith.constant 0 : index
      %c0_71 = arith.constant 0 : index
      %163 = vector.load %arg2[%c0_69, %c0_70, %c0_71] : memref<1x16x32xf32, #tpu.memory_space<vmem>>, vector<1x16x32xf32>
      %164 = vector.shape_cast %163 : vector<1x16x32xf32> to vector<16x32xf32>
      %c0_72 = arith.constant 0 : index
      %c0_73 = arith.constant 0 : index
      %165 = vector.load %arg16[%c0_72, %c0_73] : memref<16x32xf32, #tpu.memory_space<vmem>>, vector<16x32xf32>
      tpu.vector_store %arg16[%c0_72, %c0_73], %164 {strides = array<i32>} : memref<16x32xf32, #tpu.memory_space<vmem>>, vector<16x32xf32>,
    } else {
    }
    %c0 = arith.constant 0 : index
    %c0_1 = arith.constant 0 : index
    %3 = vector.load %arg16[%c0, %c0_1] : memref<16x32xf32, #tpu.memory_space<vmem>>, vector<16x32xf32>
    %c0_2 = arith.constant 0 : index
    %c0_3 = arith.constant 0 : index
    %4 = vector.load %arg3[%c0_2, %c0_3] : memref<32x32xf32, #tpu.memory_space<vmem>>, vector<32x32xf32>
    %c0_4 = arith.constant 0 : index
    %c0_5 = arith.constant 0 : index
    %c0_6 = arith.constant 0 : index
    %5 = vector.load %arg4[%c0_4, %c0_5, %c0_6] : memref<1x32x128xf32, #tpu.memory_space<vmem>>, vector<1x32x128xf32>
    %6 = vector.shape_cast %5 : vector<1x32x128xf32> to vector<32x128xf32>
    %cst = arith.constant dense<0.000000e+00> : vector<16x128xf32>
    %7 = tpu.matmul %3, %6, %cst {dimension_numbers = #tpu.dot_dimension_numbers<[1], [0], [0], [1], [0, 0, 1, 1], [], []>} : vector<16x32xf32>, vector<32x128xf32>, vector<16x128xf32> -> vector<16x128xf32>
    %8 = vector.extract_strided_slice %7 {offsets = [0, 0], sizes = [16, 32], strides = [1, 1]} : vector<16x128xf32> to vector<16x32xf32>
    %9 = vector.extract_strided_slice %7 {offsets = [0, 32], sizes = [16, 32], strides = [1, 1]} : vector<16x128xf32> to vector<16x32xf32>
    %10 = vector.extract_strided_slice %7 {offsets = [0, 64], sizes = [16, 32], strides = [1, 1]} : vector<16x128xf32> to vector<16x32xf32>
    %11 = vector.extract_strided_slice %7 {offsets = [0, 96], sizes = [16, 32], strides = [1, 1]} : vector<16x128xf32> to vector<16x32xf32>
    %12 = tpu.concatenate %10, %11 in 0 : vector<16x32xf32>, vector<16x32xf32> -> vector<32x32xf32>
    %13 = vector.extract_strided_slice %8 {offsets = [0, 0], sizes = [16, 16], strides = [1, 1]} : vector<16x32xf32> to vector<16x16xf32>
    %14 = vector.extract_strided_slice %8 {offsets = [0, 16], sizes = [16, 16], strides = [1, 1]} : vector<16x32xf32> to vector<16x16xf32>
    %15 = vector.extract_strided_slice %4 {offsets = [0, 0], sizes = [16, 16], strides = [1, 1]} : vector<32x32xf32> to vector<16x16xf32>
    %16 = vector.extract_strided_slice %4 {offsets = [0, 16], sizes = [16, 16], strides = [1, 1]} : vector<32x32xf32> to vector<16x16xf32>
    %17 = arith.addf %13, %14 : vector<16x16xf32>
    %18 = arith.mulf %15, %17 : vector<16x16xf32>
    %19 = arith.subf %14, %13 : vector<16x16xf32>
    %20 = arith.mulf %16, %19 : vector<16x16xf32>
    %21 = tpu.concatenate %18, %20 in 1 : vector<16x16xf32>, vector<16x16xf32> -> vector<16x32xf32>
    %22 = vector.extract_strided_slice %12 {offsets = [0, 0], sizes = [32, 16], strides = [1, 1]} : vector<32x32xf32> to vector<32x16xf32>
    %23 = vector.extract_strided_slice %12 {offsets = [0, 16], sizes = [32, 16], strides = [1, 1]} : vector<32x32xf32> to vector<32x16xf32>
    %24 = vector.extract_strided_slice %4 {offsets = [0, 0], sizes = [32, 16], strides = [1, 1]} : vector<32x32xf32> to vector<32x16xf32>
    %25 = vector.extract_strided_slice %4 {offsets = [0, 16], sizes = [32, 16], strides = [1, 1]} : vector<32x32xf32> to vector<32x16xf32>
    %26 = arith.addf %22, %23 : vector<32x16xf32>
    %27 = arith.mulf %24, %26 : vector<32x16xf32>
    %28 = arith.subf %23, %22 : vector<32x16xf32>
    %29 = arith.mulf %25, %28 : vector<32x16xf32>
    %30 = tpu.concatenate %27, %29 in 1 : vector<32x16xf32>, vector<32x16xf32> -> vector<32x32xf32>
    %cst_7 = arith.constant dense<0.000000e+00> : vector<32x16xf32>
    %31 = tpu.matmul %30, %21, %cst_7 {dimension_numbers = #tpu.dot_dimension_numbers<[1], [1], [0], [0], [0, 0, 1, 0], [], []>} : vector<32x32xf32>, vector<16x32xf32>, vector<32x16xf32> -> vector<32x16xf32>
    %32 = tpu.iota {dimensions = array<i32: 0>} : vector<32x16xi32>
    %33 = tpu.iota {dimensions = array<i32: 1>} : vector<32x16xi32>
    %c15_i32 = arith.constant 15 : i32
    %34 = vector.broadcast %c15_i32 : i32 to vector<32x16xi32>
    %35 = arith.andi %32, %34 : vector<32x16xi32>
    %36 = arith.cmpi sle, %33, %35 : vector<32x16xi32>
    %cst_8 = arith.constant 0xFF800000 : f32
    %37 = vector.broadcast %cst_8 : f32 to vector<32x16xf32>
    %38 = arith.select %36, %31, %37 : vector<32x16xi1>, vector<32x16xf32>
    %cst_9 = arith.constant dense<0xFF800000> : vector<32xf32>
    %39 = vector.multi_reduction <maximumf>, %38, %cst_9 [1] : vector<32x16xf32> to vector<32xf32>
    %40 = vector.shape_cast %39 : vector<32xf32> to vector<32x1xf32>
    %41 = vector.broadcast %40 : vector<32x1xf32> to vector<32x16xf32>
    %42 = arith.subf %38, %41 : vector<32x16xf32>
    %43 = math.exp %42 : vector<32x16xf32>
    %cst_10 = arith.constant dense<0.000000e+00> : vector<32xf32>
    %44 = vector.multi_reduction <add>, %43, %cst_10 [1] : vector<32x16xf32> to vector<32xf32>
    %45 = vector.shape_cast %44 : vector<32xf32> to vector<32x1xf32>
    %46 = tpu.reciprocal %45 {approx = true} : vector<32x1xf32> -> vector<32x1xf32>
    %47 = vector.broadcast %46 : vector<32x1xf32> to vector<32x16xf32>
    %48 = arith.mulf %43, %47 : vector<32x16xf32>
    %cst_11 = arith.constant dense<0.000000e+00> : vector<32x32xf32>
    %49 = tpu.matmul %48, %9, %cst_11 {dimension_numbers = #tpu.dot_dimension_numbers<[1], [0], [0], [1], [0, 0, 1, 1], [], []>} : vector<32x16xf32>, vector<16x32xf32>, vector<32x32xf32> -> vector<32x32xf32>
    %c0_12 = arith.constant 0 : index
    %c0_13 = arith.constant 0 : index
    %c0_14 = arith.constant 0 : index
    %50 = vector.load %arg5[%c0_12, %c0_13, %c0_14] : memref<1x64x32xf32, #tpu.memory_space<vmem>>, vector<1x64x32xf32>
    %51 = vector.shape_cast %50 : vector<1x64x32xf32> to vector<64x32xf32>
    %cst_15 = arith.constant 0.000000e+00 : f32
    %52 = vector.broadcast %cst_15 : f32 to vector<16x32xf32>
    %53 = vector.extract_strided_slice %49 {offsets = [0, 0], sizes = [16, 32], strides = [1, 1]} : vector<32x32xf32> to vector<16x32xf32>
    %54 = vector.extract_strided_slice %51 {offsets = [0, 0], sizes = [32, 32], strides = [1, 1]} : vector<64x32xf32> to vector<32x32xf32>
    %cst_16 = arith.constant dense<0.000000e+00> : vector<16x32xf32>
    %55 = tpu.matmul %53, %54, %cst_16 {dimension_numbers = #tpu.dot_dimension_numbers<[1], [0], [0], [1], [0, 0, 1, 1], [], []>} : vector<16x32xf32>, vector<32x32xf32>, vector<16x32xf32> -> vector<16x32xf32>
    %56 = arith.addf %52, %55 : vector<16x32xf32>
    %57 = vector.extract_strided_slice %49 {offsets = [16, 0], sizes = [16, 32], strides = [1, 1]} : vector<32x32xf32> to vector<16x32xf32>
    %58 = vector.extract_strided_slice %51 {offsets = [32, 0], sizes = [32, 32], strides = [1, 1]} : vector<64x32xf32> to vector<32x32xf32>
    %cst_17 = arith.constant dense<0.000000e+00> : vector<16x32xf32>
    %59 = tpu.matmul %57, %58, %cst_17 {dimension_numbers = #tpu.dot_dimension_numbers<[1], [0], [0], [1], [0, 0, 1, 1], [], []>} : vector<16x32xf32>, vector<32x32xf32>, vector<16x32xf32> -> vector<16x32xf32>
    %60 = arith.addf %56, %59 : vector<16x32xf32>
    %c0_18 = arith.constant 0 : index
    %c0_19 = arith.constant 0 : index
    %c0_20 = arith.constant 0 : index
    %61 = vector.load %arg12[%c0_18, %c0_19, %c0_20] : memref<1x1x32xf32, #tpu.memory_space<vmem>>, vector<1x1x32xf32>
    %62 = vector.shape_cast %61 : vector<1x1x32xf32> to vector<1x32xf32>
    %63 = arith.addf %3, %60 : vector<16x32xf32>
    %64 = arith.mulf %63, %63 : vector<16x32xf32>
    %cst_21 = arith.constant dense<0.000000e+00> : vector<16xf32>
    %65 = vector.multi_reduction <add>, %64, %cst_21 [1] : vector<16x32xf32> to vector<16xf32>
    %66 = vector.shape_cast %65 : vector<16xf32> to vector<16x1xf32>
    %cst_22 = arith.constant 3.200000e+01 : f32
    %67 = vector.broadcast %cst_22 : f32 to vector<16x1xf32>
    %68 = arith.divf %66, %67 : vector<16x1xf32>
    %cst_23 = arith.constant 9.99999997E-7 : f32
    %69 = vector.broadcast %cst_23 : f32 to vector<16x1xf32>
    %70 = arith.addf %68, %69 : vector<16x1xf32>
    %71 = math.rsqrt %70 : vector<16x1xf32>
    %72 = vector.broadcast %71 : vector<16x1xf32> to vector<16x32xf32>
    %73 = arith.mulf %63, %72 : vector<16x32xf32>
    %74 = vector.broadcast %62 : vector<1x32xf32> to vector<16x32xf32>
    %75 = arith.mulf %73, %74 : vector<16x32xf32>
    %c0_24 = arith.constant 0 : index
    %c0_25 = arith.constant 0 : index
    %c0_26 = arith.constant 0 : index
    %76 = vector.load %arg6[%c0_24, %c0_25, %c0_26] : memref<1x32x128xf32, #tpu.memory_space<vmem>>, vector<1x32x128xf32>
    %77 = vector.shape_cast %76 : vector<1x32x128xf32> to vector<32x128xf32>
    %cst_27 = arith.constant dense<0.000000e+00> : vector<16x128xf32>
    %78 = tpu.matmul %75, %77, %cst_27 {dimension_numbers = #tpu.dot_dimension_numbers<[1], [0], [0], [1], [0, 0, 1, 1], [], []>} : vector<16x32xf32>, vector<32x128xf32>, vector<16x128xf32> -> vector<16x128xf32>
    %c0_28 = arith.constant 0 : index
    %c0_29 = arith.constant 0 : index
    %c0_30 = arith.constant 0 : index
    %79 = vector.load %arg7[%c0_28, %c0_29, %c0_30] : memref<1x1x128xf32, #tpu.memory_space<vmem>>, vector<1x1x128xf32>
    %80 = vector.shape_cast %79 : vector<1x1x128xf32> to vector<1x128xf32>
    %81 = vector.broadcast %80 : vector<1x128xf32> to vector<16x128xf32>
    %82 = arith.addf %78, %81 : vector<16x128xf32>
    %c0_31 = arith.constant 0 : index
    %c0_32 = arith.constant 0 : index
    %c0_33 = arith.constant 0 : index
    %83 = vector.load %arg8[%c0_31, %c0_32, %c0_33] : memref<1x128x256xf32, #tpu.memory_space<vmem>>, vector<1x128x256xf32>
    %84 = vector.shape_cast %83 : vector<1x128x256xf32> to vector<128x256xf32>
    %cst_34 = arith.constant dense<0.000000e+00> : vector<16x256xf32>
    %85 = tpu.matmul %82, %84, %cst_34 {dimension_numbers = #tpu.dot_dimension_numbers<[1], [0], [0], [1], [0, 0, 1, 1], [], []>} : vector<16x128xf32>, vector<128x256xf32>, vector<16x256xf32> -> vector<16x256xf32>
    %86 = vector.extract_strided_slice %85 {offsets = [0, 0], sizes = [16, 128], strides = [1, 1]} : vector<16x256xf32> to vector<16x128xf32>
    %87 = vector.extract_strided_slice %85 {offsets = [0, 128], sizes = [16, 128], strides = [1, 1]} : vector<16x256xf32> to vector<16x128xf32>
    %cst_35 = arith.constant 5.000000e-01 : f32
    %88 = vector.broadcast %cst_35 : f32 to vector<16x128xf32>
    %89 = arith.mulf %88, %86 : vector<16x128xf32>
    %cst_36 = arith.constant 0.707106769 : f32
    %90 = vector.broadcast %cst_36 : f32 to vector<16x128xf32>
    %91 = arith.mulf %86, %90 : vector<16x128xf32>
    %cst_37 = arith.constant -3.8325069 : f32
    %cst_38 = arith.constant 3.8325069 : f32
    %92 = vector.broadcast %cst_37 : f32 to vector<16x128xf32>
    %93 = arith.maximumf %92, %91 : vector<16x128xf32>
    %94 = vector.broadcast %cst_38 : f32 to vector<16x128xf32>
    %95 = arith.minimumf %94, %93 : vector<16x128xf32>
    %96 = arith.mulf %95, %95 : vector<16x128xf32>
    %cst_39 = arith.constant 2.29050653E-4 : f32
    %97 = vector.broadcast %cst_39 : f32 to vector<16x128xf32>
    %98 = arith.mulf %97, %96 : vector<16x128xf32>
    %cst_40 = arith.constant 0.00340829091 : f32
    %99 = vector.broadcast %cst_40 : f32 to vector<16x128xf32>
    %100 = arith.addf %98, %99 : vector<16x128xf32>
    %101 = arith.mulf %100, %96 : vector<16x128xf32>
    %cst_41 = arith.constant 0.0509556942 : f32
    %102 = vector.broadcast %cst_41 : f32 to vector<16x128xf32>
    %103 = arith.addf %101, %102 : vector<16x128xf32>
    %104 = arith.mulf %103, %96 : vector<16x128xf32>
    %cst_42 = arith.constant 0.185208321 : f32
    %105 = vector.broadcast %cst_42 : f32 to vector<16x128xf32>
    %106 = arith.addf %104, %105 : vector<16x128xf32>
    %107 = arith.mulf %106, %96 : vector<16x128xf32>
    %cst_43 = arith.constant 1.12837911 : f32
    %108 = vector.broadcast %cst_43 : f32 to vector<16x128xf32>
    %109 = arith.addf %107, %108 : vector<16x128xf32>
    %cst_44 = arith.constant -1.17916031E-7 : f32
    %110 = vector.broadcast %cst_44 : f32 to vector<16x128xf32>
    %111 = arith.mulf %110, %96 : vector<16x128xf32>
    %cst_45 = arith.constant 2.35479656E-5 : f32
    %112 = vector.broadcast %cst_45 : f32 to vector<16x128xf32>
    %113 = arith.addf %111, %112 : vector<16x128xf32>
    %114 = arith.mulf %113, %96 : vector<16x128xf32>
    %cst_46 = arith.constant 0.00101796258 : f32
    %115 = vector.broadcast %cst_46 : f32 to vector<16x128xf32>
    %116 = arith.addf %114, %115 : vector<16x128xf32>
    %117 = arith.mulf %116, %96 : vector<16x128xf32>
    %cst_47 = arith.constant 0.0140704699 : f32
    %118 = vector.broadcast %cst_47 : f32 to vector<16x128xf32>
    %119 = arith.addf %117, %118 : vector<16x128xf32>
    %120 = arith.mulf %119, %96 : vector<16x128xf32>
    %cst_48 = arith.constant 0.110985048 : f32
    %121 = vector.broadcast %cst_48 : f32 to vector<16x128xf32>
    %122 = arith.addf %120, %121 : vector<16x128xf32>
    %123 = arith.mulf %122, %96 : vector<16x128xf32>
    %cst_49 = arith.constant 0.497469246 : f32
    %124 = vector.broadcast %cst_49 : f32 to vector<16x128xf32>
    %125 = arith.addf %123, %124 : vector<16x128xf32>
    %126 = arith.mulf %125, %96 : vector<16x128xf32>
    %cst_50 = arith.constant 1.000000e+00 : f32
    %127 = vector.broadcast %cst_50 : f32 to vector<16x128xf32>
    %128 = arith.addf %126, %127 : vector<16x128xf32>
    %129 = arith.mulf %95, %109 : vector<16x128xf32>
    %130 = tpu.reciprocal %128 {approx = true} : vector<16x128xf32> -> vector<16x128xf32>
    %131 = arith.mulf %129, %130 : vector<16x128xf32>
    %cst_51 = arith.constant 1.000000e+00 : f32
    %132 = vector.broadcast %cst_51 : f32 to vector<16x128xf32>
    %133 = arith.addf %132, %131 : vector<16x128xf32>
    %134 = arith.mulf %89, %133 : vector<16x128xf32>
    %135 = arith.mulf %134, %87 : vector<16x128xf32>
    %c0_52 = arith.constant 0 : index
    %c0_53 = arith.constant 0 : index
    %c0_54 = arith.constant 0 : index
    %136 = vector.load %arg9[%c0_52, %c0_53, %c0_54] : memref<1x128x128xf32, #tpu.memory_space<vmem>>, vector<1x128x128xf32>
    %137 = vector.shape_cast %136 : vector<1x128x128xf32> to vector<128x128xf32>
    %cst_55 = arith.constant dense<0.000000e+00> : vector<16x128xf32>
    %138 = tpu.matmul %135, %137, %cst_55 {dimension_numbers = #tpu.dot_dimension_numbers<[1], [0], [0], [1], [0, 0, 1, 1], [], []>} : vector<16x128xf32>, vector<128x128xf32>, vector<16x128xf32> -> vector<16x128xf32>
    %c0_56 = arith.constant 0 : index
    %c0_57 = arith.constant 0 : index
    %c0_58 = arith.constant 0 : index
    %139 = vector.load %arg10[%c0_56, %c0_57, %c0_58] : memref<1x128x32xf32, #tpu.memory_space<vmem>>, vector<1x128x32xf32>
    %140 = vector.shape_cast %139 : vector<1x128x32xf32> to vector<128x32xf32>
    %cst_59 = arith.constant dense<0.000000e+00> : vector<16x32xf32>
    %141 = tpu.matmul %138, %140, %cst_59 {dimension_numbers = #tpu.dot_dimension_numbers<[1], [0], [0], [1], [0, 0, 1, 1], [], []>} : vector<16x128xf32>, vector<128x32xf32>, vector<16x32xf32> -> vector<16x32xf32>
    %c0_60 = arith.constant 0 : index
    %c0_61 = arith.constant 0 : index
    %c0_62 = arith.constant 0 : index
    %142 = vector.load %arg11[%c0_60, %c0_61, %c0_62] : memref<1x1x32xf32, #tpu.memory_space<vmem>>, vector<1x1x32xf32>
    %143 = vector.shape_cast %142 : vector<1x1x32xf32> to vector<1x32xf32>
    %144 = vector.broadcast %143 : vector<1x32xf32> to vector<16x32xf32>
    %145 = arith.addf %141, %144 : vector<16x32xf32>
    %146 = arith.addf %75, %145 : vector<16x32xf32>
    %147 = arith.mulf %146, %146 : vector<16x32xf32>
    %cst_63 = arith.constant dense<0.000000e+00> : vector<16xf32>
    %148 = vector.multi_reduction <add>, %147, %cst_63 [1] : vector<16x32xf32> to vector<16xf32>
    %149 = vector.shape_cast %148 : vector<16xf32> to vector<16x1xf32>
    %cst_64 = arith.constant 3.200000e+01 : f32
    %150 = vector.broadcast %cst_64 : f32 to vector<16x1xf32>
    %151 = arith.divf %149, %150 : vector<16x1xf32>
    %cst_65 = arith.constant 9.99999997E-7 : f32
    %152 = vector.broadcast %cst_65 : f32 to vector<16x1xf32>
    %153 = arith.addf %151, %152 : vector<16x1xf32>
    %154 = math.rsqrt %153 : vector<16x1xf32>
    %155 = vector.broadcast %154 : vector<16x1xf32> to vector<16x32xf32>
    %156 = arith.mulf %146, %155 : vector<16x32xf32>
    %157 = vector.broadcast %62 : vector<1x32xf32> to vector<16x32xf32>
    %158 = arith.mulf %156, %157 : vector<16x32xf32>
    %c0_66 = arith.constant 0 : index
    %c0_67 = arith.constant 0 : index
    %159 = vector.load %arg16[%c0_66, %c0_67] : memref<16x32xf32, #tpu.memory_space<vmem>>, vector<16x32xf32>
    tpu.vector_store %arg16[%c0_66, %c0_67], %158 {strides = array<i32>} : memref<16x32xf32, #tpu.memory_space<vmem>>, vector<16x32xf32>,
    %c1_i32 = arith.constant 1 : i32
    %160 = arith.cmpi eq, %arg1, %c1_i32 : i32
    %161 = arith.extui %160 : i1 to i32
    %c0_i32_68 = arith.constant 0 : i32
    %162 = arith.cmpi ne, %161, %c0_i32_68 : i32
    scf.if %162 {
      %c0_69 = arith.constant 0 : index
      %c0_70 = arith.constant 0 : index
      %163 = vector.load %arg13[%c0_69, %c0_70] : memref<32x128xf32, #tpu.memory_space<vmem>>, vector<32x128xf32>
      %cst_71 = arith.constant dense<0.000000e+00> : vector<16x128xf32>
      %164 = tpu.matmul %158, %163, %cst_71 {dimension_numbers = #tpu.dot_dimension_numbers<[1], [0], [0], [1], [0, 0, 1, 1], [], []>} : vector<16x32xf32>, vector<32x128xf32>, vector<16x128xf32> -> vector<16x128xf32>
      %c0_72 = arith.constant 0 : index
      %c0_73 = arith.constant 0 : index
      %165 = vector.load %arg14[%c0_72, %c0_73] : memref<1x128xf32, #tpu.memory_space<vmem>>, vector<1x128xf32>
      %166 = vector.broadcast %165 : vector<1x128xf32> to vector<16x128xf32>
      %167 = arith.addf %164, %166 : vector<16x128xf32>
      %c0_74 = arith.constant 0 : index
      %c0_75 = arith.constant 0 : index
      %c0_76 = arith.constant 0 : index
      %168 = vector.load %arg15[%c0_74, %c0_75, %c0_76] : memref<1x16x128xf32, #tpu.memory_space<vmem>>, vector<1x16x128xf32>
      %169 = vector.shape_cast %168 : vector<1x16x128xf32> to vector<16x128xf32>
      %170 = vector.shape_cast %167 : vector<16x128xf32> to vector<1x16x128xf32>
      tpu.vector_store %arg15[%c0_74, %c0_75, %c0_76], %170 {strides = array<i32>} : memref<1x16x128xf32, #tpu.memory_space<vmem>>, vector<1x16x128xf32>,
    } else {
    }
    return
  }
  func.func @transform_0(%arg0: i32, %arg1: i32) -> (i32, i32, i32) {
    %c0_i32 = arith.constant 0 : i32
    %c0_i32_0 = arith.constant 0 : i32
    %c0_i32_1 = arith.constant 0 : i32
    return %arg0, %c0_i32, %c0_i32_0 : i32, i32, i32
  }
  func.func @transform_1(%arg0: i32, %arg1: i32) -> (i32, i32) {
    %c0_i32 = arith.constant 0 : i32
    %c0_i32_0 = arith.constant 0 : i32
    %c0_i32_1 = arith.constant 0 : i32
    return %c0_i32, %c0_i32_0 : i32, i32
  }
  func.func @transform_2(%arg0: i32, %arg1: i32) -> (i32, i32, i32) {
    %c0_i32 = arith.constant 0 : i32
    %c0_i32_0 = arith.constant 0 : i32
    %c0_i32_1 = arith.constant 0 : i32
    return %arg1, %c0_i32, %c0_i32_0 : i32, i32, i32
  }
  func.func @transform_3(%arg0: i32, %arg1: i32) -> (i32, i32, i32) {
    %c0_i32 = arith.constant 0 : i32
    %c0_i32_0 = arith.constant 0 : i32
    %c0_i32_1 = arith.constant 0 : i32
    return %arg1, %c0_i32, %c0_i32_0 : i32, i32, i32
  }
  func.func @transform_4(%arg0: i32, %arg1: i32) -> (i32, i32, i32) {
    %c0_i32 = arith.constant 0 : i32
    %c0_i32_0 = arith.constant 0 : i32
    %c0_i32_1 = arith.constant 0 : i32
    return %arg1, %c0_i32, %c0_i32_0 : i32, i32, i32
  }
  func.func @transform_5(%arg0: i32, %arg1: i32) -> (i32, i32, i32) {
    %c0_i32 = arith.constant 0 : i32
    %c0_i32_0 = arith.constant 0 : i32
    %c0_i32_1 = arith.constant 0 : i32
    return %arg1, %c0_i32, %c0_i32_0 : i32, i32, i32
  }
  func.func @transform_6(%arg0: i32, %arg1: i32) -> (i32, i32, i32) {
    %c0_i32 = arith.constant 0 : i32
    %c0_i32_0 = arith.constant 0 : i32
    %c0_i32_1 = arith.constant 0 : i32
    return %arg1, %c0_i32, %c0_i32_0 : i32, i32, i32
  }
  func.func @transform_7(%arg0: i32, %arg1: i32) -> (i32, i32, i32) {
    %c0_i32 = arith.constant 0 : i32
    %c0_i32_0 = arith.constant 0 : i32
    %c0_i32_1 = arith.constant 0 : i32
    return %arg1, %c0_i32, %c0_i32_0 : i32, i32, i32
  }
  func.func @transform_8(%arg0: i32, %arg1: i32) -> (i32, i32, i32) {
    %c0_i32 = arith.constant 0 : i32
    %c0_i32_0 = arith.constant 0 : i32
    %c0_i32_1 = arith.constant 0 : i32
    return %arg1, %c0_i32, %c0_i32_0 : i32, i32, i32
  }
  func.func @transform_9(%arg0: i32, %arg1: i32) -> (i32, i32, i32) {
    %c0_i32 = arith.constant 0 : i32
    %c0_i32_0 = arith.constant 0 : i32
    %c0_i32_1 = arith.constant 0 : i32
    return %arg1, %c0_i32, %c0_i32_0 : i32, i32, i32
  }
  func.func @transform_10(%arg0: i32, %arg1: i32) -> (i32, i32, i32) {
    %c0_i32 = arith.constant 0 : i32
    %c0_i32_0 = arith.constant 0 : i32
    %c0_i32_1 = arith.constant 0 : i32
    return %arg1, %c0_i32, %c0_i32_0 : i32, i32, i32
  }
  func.func @transform_11(%arg0: i32, %arg1: i32) -> (i32, i32) {
    %c0_i32 = arith.constant 0 : i32
    %c0_i32_0 = arith.constant 0 : i32
    %c0_i32_1 = arith.constant 0 : i32
    return %c0_i32, %c0_i32_0 : i32, i32
  }
  func.func @transform_12(%arg0: i32, %arg1: i32) -> (i32, i32) {
    %c0_i32 = arith.constant 0 : i32
    %c0_i32_0 = arith.constant 0 : i32
    %c0_i32_1 = arith.constant 0 : i32
    return %c0_i32, %c0_i32_0 : i32, i32
  }
  func.func @transform_13(%arg0: i32, %arg1: i32) -> (i32, i32, i32) {
    %c0_i32 = arith.constant 0 : i32
    %c0_i32_0 = arith.constant 0 : i32
    %c0_i32_1 = arith.constant 0 : i32
    return %arg0, %c0_i32, %c0_i32_0 : i32, i32, i32
  }
}

</mosaic_0001>

<bundles_post_ra>
// kernel: gemma_forward.1
= control target key start
LH: loop header
LB: loop body
LE: loop exit
PB: predicated region body
PF: predicated region fallthrough
CT: control target
= control target key end

     0   :  { %s2470_s0 = inlined_call_operand.vmem [shape: f32[2,16,32], index: 0, kind: input, shape index: {}]   ;;  %s2471_s1 = inlined_call_operand.vmem [shape: f32[32,32], index: 1, kind: input, shape index: {}]   ;;  %s2472_s2 = inlined_call_operand.vmem [shape: f32[2,32,128], index: 2, kind: input, shape index: {}]   ;;  %s2473_s3 = inlined_call_operand.vmem [shape: f32[2,64,32], index: 3, kind: input, shape index: {}]   ;;  %s2474_s4 = inlined_call_operand.vmem [shape: f32[2,32,128], index: 4, kind: input, shape index: {}]   ;;  %s2475_s5 = inlined_call_operand.vmem [shape: f32[2,1,128], index: 5, kind: input, shape index: {}]   ;;  %s2476_s6 = inlined_call_operand.hbm [shape: f32[2,128,256], index: 6, kind: input, shape index: {}]   ;;  %s2477_s7 = inlined_call_operand.vmem [shape: f32[2,128,128], index: 7, kind: input, shape index: {}]   ;;  %s2478_s8 = inlined_call_operand.vmem [shape: f32[2,128,32], index: 8, kind: input, shape index: {}]   ;;  %s2479_s9 = inlined_call_operand.vmem [shape: f32[2,1,32], index: 9, kind: input, shape index: {}]   ;;  %s2480_s10 = inlined_call_operand.vmem [shape: f32[2,1,32], index: 10, kind: input, shape index: {}]   ;;  %s2481_s11 = inlined_call_operand.vmem [shape: f32[32,128], index: 11, kind: input, shape index: {}]   ;;  %s2482_s12 = inlined_call_operand.vmem [shape: f32[1,128], index: 12, kind: input, shape index: {}]   ;;  %s2483_s13 = inlined_call_operand.hbm [shape: f32[2,16,128], index: 13, kind: output, shape index: {}]  }
   0x1   :  { %2501 = sst [smem:[#allocation22_spill]] %s2470_s0 }
   0x2   :  { %2502 = sst [smem:[#allocation23_spill]] %s2471_s1 }
   0x3   :  { %2503 = sst [smem:[#allocation24_spill]] %s2472_s2 }
   0x4   :  { %2504 = sst [smem:[#allocation25_spill]] %s2473_s3 }
   0x5   :  { %2505 = sst [smem:[#allocation26_spill]] %s2476_s6 }
   0x6   :  { %2506 = sst [smem:[#allocation27_spill]] %s2480_s10 }
   0x7   :  { %2507 = sst [smem:[#allocation28_spill]] %s2481_s11 }
   0x8   :  { %2508 = sst [smem:[#allocation29_spill]] %s2482_s12 }
   0x9   :  { %2509 = sst [smem:[#allocation30_spill]] %s2483_s13 }
   0xa   :  { %18 = vsyncpa [#allocation4], 0 }
   0xb   :  { %20 = vsyncpa [#allocation4 + $0x1], 0 }
   0xc   :  { %21 = vsyncpa [#allocation5], 0 }
   0xd   :  { %23 = vsyncpa [#allocation5 + $0x1], 0  ;;  %s2027_s25 = smov 0   ;;  %s2029_s26 = smov 0  }
   0xe   :  { %s2031_s27 = smov 0   ;;  %s2033_s28 = smov 0  }
   0xf   :  { %s2035_s29 = smov 0   ;;  %s2037_s30 = smov 0  }
  0x10   :  { %s2039_s14 = smov 0   ;;  %s2041_s15 = smov 0  }
  0x11   :  { %s2043_s16 = smov 0   ;;  %s2045_s17 = smov 0  }
  0x12   :  { %s2047_s18 = smov 0  }
  0x13 LB: > { %2510 = sst [smem:[#allocation9_spill]] %s1906_s25  ;;  %s1582_s19 = sadd.s32 4294967295, %s1946_s18   ;;  %s1946_s18 = sphi %s2047_s18, %s29_s18   ;;  %s1942_s17 = sphi %s2045_s17, %s2551_s17   ;;  %s1938_s16 = sphi %s2043_s16, %s2550_s16   ;;  %s1934_s15 = sphi %s2041_s15, %s2549_s15   ;;  %s1930_s14 = sphi %s2039_s14, %s2548_s14   ;;  %s1926_s30 = sphi %s2037_s30, %s2547_s30   ;;  %s1922_s29 = sphi %s2035_s29, %s2546_s29   ;;  %s1918_s28 = sphi %s2033_s28, %s2545_s28   ;;  %s1914_s27 = sphi %s2031_s27, %s2544_s27   ;;  %s1910_s26 = sphi %s2029_s26, %s2553_s26   ;;  %s1906_s25 = sphi %s2027_s25, %s2552_s25  }
  0x14   : > { %2511 = sst [smem:[#allocation10_spill]] %s1914_s27  ;;  %s1583_s20 = sadd.s32 4294967294, %s1946_s18  }
  0x15   : > { %2512 = sst [smem:[#allocation11_spill]] %s1922_s29  ;;  %s38_s21 = sadd.s32 1, %s1938_s16 }
  0x16   : > { %2513 = sst [smem:[#allocation12_spill]] %s1926_s30  ;;  %s41_s22 = sadd.s32 1, %s1942_s17 }
  0x17   : > { %2514 = sst [smem:[#allocation13_spill]] %s1938_s16  ;;  %p39_p0 = scmp.ge.s32.totalorder %s38_s21, 2 }
  0x18   : > { %2515 = sst [smem:[#allocation14_spill]] %s1942_s17  ;;  %s199_s23 = sadd.s32 1, %s1926_s30 }
  0x19   : > { %2516 = sst [smem:[#allocation15_spill]] %s1946_s18  ;;  %p206_p1 = scmp.ne.s32.totalorder %s1926_s30, %s1922_s29 }
  0x1a   : > { %p207_p2 = scmp.eq.s32.totalorder %s1946_s18, 0  ;;  %s2555_s21 = smov (%p39_p0, %s38_s21), 0 }
  0x1b   : > { %2517 = sst [smem:[#allocation16_spill]] %s2555_s21  ;;  %s2557_s22 = smov (!%p39_p0, %s41_s22), %s1942_s17 }
  0x1c   : > { %s196_s24 = ssub.s32 %s1938_s16, %s2555_s21  ;;  %p2093_p3 = por %p207_p2, %p206_p1 }
  0x1d   : > { %p43_p4 = scmp.ge.s32.totalorder %s2557_s22, 2  ;;  %p197_p5 = scmp.eq.s32.totalorder %s196_s24, 0 }
  0x1e   : > { %p212_p6 = scmp.ne.s32.totalorder %s1922_s29, %s1918_s28  ;;  %p213_p7 = scmp.eq.s32.totalorder %s1582_s19, 0 }
  0x1f   : > { %s2559_s22 = smov (%p43_p4, %s2557_s22), 0  ;;  %s371_s1 = sadd.s32 1, %s1914_s27 }
  0x20   : > { %2519 = sst [smem:[#allocation17_spill]] %s2559_s22  ;;  %p2103_p8 = por %p213_p7, %p212_p6 }
  0x21   : > { %s2101_s12 = scalar_select %p197_p5, %s1926_s30, %s199_s23  }
  0x22   : > { %s368_s11 = ssub.s32 %s1942_s17, %s2559_s22  ;;  %p381_p10 = scmp.ne.s32.totalorder %s1914_s27, %s1910_s26 }
  0x23   : > { %2520 = sst [smem:[#allocation18_spill]] %s2101_s12  ;;  %p369_p9 = scmp.eq.s32.totalorder %s368_s11, 0 }
  0x24   : > { %p382_p11 = scmp.eq.s32.totalorder %s1582_s19, 3  ;;  %p387_p13 = scmp.ne.s32.totalorder %s1910_s26, %s1906_s25 }
  0x25   : > { %s2113_s24 = scalar_select %p369_p9, %s1914_s27, %s371_s1  }
  0x26   : > { %p2115_p12 = por %p382_p11, %p381_p10  ;;  %p388_p0 = scmp.eq.s32.totalorder %s1583_s20, 3 }
  0x27   : > { %2522 = sst [smem:[#allocation19_spill]] %s2113_s24  ;;  %p1661_p1 = scmp.lt.s32.totalorder %s1946_s18, 4 }
  0x28   : > { %s2523_s28 = scalar_select %p2115_p12, 1, 0 }
  0x29   : > { %s455_s23 = sand.u32 1, %s1926_s30   ;;  %p2123_p2 = por %p388_p0, %p387_p13 }
  0x2a   : > { %2524 = sst [smem:[#allocation20_spill]] %s2523_s28  ;;  %s1586_s11 = sshll.u32 %s455_s23, 8 }
  0x2b   : > { %s2525_s12 = scalar_select %p2123_p2, 1, 0 }
  0x2c   : > { %s1633_s22 = sshll.u32 %s1938_s16, 8  ;;  %s2527_s6 = sld [smem:[#allocation26_spill]] }
  0x2d   : > { %2526 = sst [smem:[#allocation21_spill]] %s2525_s12  ;;  %s459_s27 = scalar_lea.vmem [#allocation3], %s1586_s11 }
  0x2e   : > { %s467_s10 = sshll.u32 %s459_s27, 4  ;;  %p1654_p4 = pnand %p1661_p1, %p2093_p3  ;;  %s468_s10 = int_to_ptr.vmem [resolvable:$true] %s467_s10 }
  0x2f   : > { %p1589_p5 = scmp.ge.s32.totalorder %s1946_s18, 1  ;;  %p503_p6 = scmp.lt.s32.totalorder %s1946_s18, 5 }
  0x30   : > { %s456_s20 = scalar_lea.sflag [#allocation4], %s455_s23  ;;  %s1948_s30 = smov 256  }
  0x31   : > { %s1949_s25 = smov 16   ;;  %p504_p7 = pnand %p1589_p5, %p503_p6 }
  0x32   : > { %s464_s1 = scalar_lea.hbm %s2527_s6, %s1633_s22  ;;  %s509_s16 = sand.u32 (!%p504_p7), 1, %s1922_s29  }
  0x33   : > { %s465_s24 = sshll.u32 %s464_s1, 4  ;;  %507 = sbr.rel (%p504_p7) target bundleno = 2243 (0x8c3), region = 72  ;;  %s466_s24 = int_to_ptr.hbm [resolvable:$true] %s465_s24 }
  0x34   : > { %1656 = dma.hbm_to_vmem [thread:$0]  (!%p1654_p4), %s466_s24, 4096, %s468_s10, %s456_s20, %s1948_s30, %s1948_s30, %s1949_s25  }
  0x35   : > { %s1590_s17 = sshll.u32 (!%p504_p7), %s509_s16, 8  ;;  %s510_s22 = scalar_lea.sflag (!%p504_p7), [#allocation4], %s509_s16 }
  0x36   : > { %s2136_s19 = scalar_lea.vmem (!%p504_p7), [#allocation3], %s1590_s17 }
  0x38   : > { %1897 = dma.done.wait (%p2103_p8), %s510_s22, 4096  }
  0x39   : > { %1899 = vsyncadd (%p2103_p8), %s510_s22, 4294963200  ;;  %s2494_s10 = sand.u32 1, %s1910_s26   ;;  %p596_p3 = scmp.lt.s32.totalorder %s1934_s15, 1 }
  0x3a   : > { %s1591_s13 = sshll.u32 %s2494_s10, 4  ;;  %p601_p9 = scmp.lt.s32.totalorder %s1930_s14, 1 }
  0x3b   : > { %s597_s25 = scalar_select %p596_p3, %s1934_s15, 1 }
  0x3c   : > { %s2149_s27 = scalar_select %p601_p9, %s1930_s14, 1 }
  0x3d   : > { %s1634_s30 = sshll.u32 %s597_s25, 4  ;;  %s2528_s0 = sld [smem:[#allocation22_spill]] }
  0x3e   : > { %s1635_s23 = sshll.u32 %s2149_s27, 5  ;;  %s2529_s2 = sld [smem:[#allocation24_spill]] }
  0x3f   : > { %s1636_s17 = sshll.u32 %s2149_s27, 6  ;;  %s2530_s3 = sld [smem:[#allocation25_spill]] }
  0x40   : > { %s2167_s18 = scalar_lea.vmem %s2474_s4, %s1635_s23  ;;  %s1638_s16 = sshll.u32 %s2149_s27, 7 }
  0x41   : > { %s2177_s11 = scalar_lea.vmem %s2477_s7, %s1638_s16  ;;  %s2182_s10 = scalar_lea.vmem %s2478_s8, %s1638_s16 }
  0x42   : > { %s631_s12 = scalar_lea.vmem %s2479_s9, %s2149_s27  ;;  %s2192_s25 = scalar_lea.vmem [#allocation6], %s1591_s13 }
  0x43   : > { %s600_s24 = scalar_lea.vmem %s2528_s0, %s1634_s30  ;;  %s618_s30 = scalar_lea.vmem %s2475_s5, %s2149_s27 }
  0x44   : > { %s605_s20 = scalar_lea.vmem %s2529_s2, %s1635_s23  ;;  %p1604_p8 = scmp.ne.s32.totalorder %s1930_s14, 0 }
  0x45   : > { %s2162_s6 = scalar_lea.vmem %s2530_s3, %s1636_s17  ;;  %s2531_s3 = sld [smem:[#allocation27_spill]] }
  0x47   : > { %638 = sbr.rel (%p1604_p8) target bundleno = 79 (0x4f), region = 80 }
  0x4b   : > { %s634_s28 = scalar_lea.vmem %s2531_s3, %s2149_s27 }
  0x4c   : > { %v639_v0 = vld [vmem:[%s600_s24] sm:$0xff]  ;;  %vm641_vm0 = vcmask 261120   ;;  %v640_v1 = vld [vmem:[%s600_s24 + $0x8] sm:$0xff] }
  0x4d   : > { %642 = vst.msk [vmem:[#allocation2] sm:$0xff] %vm641_vm0, %v639_v0 }
  0x4e   : > { %643 = vst.msk [vmem:[#allocation2 + $0x8] sm:$0xff] %vm641_vm0, %v640_v1 }
  0x4f PF: > { %v653_v2 = vld [vmem:[%s605_s20 + $0x18] sm:$0xff]  ;;  %v652_v3 = vld [vmem:[%s605_s20 + $0x10] sm:$0xff]  ;;  %v651_v4 = vld [vmem:[%s605_s20 + $0x8] sm:$0xff]  ;;  %vm654_vm1 = vcmask 261120   ;;  %s1950_s0 = smov 112   ;;  %s1951_s2 = smov 96   ;;  %v822_v55 = vlaneseq }
  0x50   : > { %673 = vmatpush.msra.mxu0 %v653_v2  ;;  %1641 = vmatpush.msra.mxu2 %v653_v2  ;;  %v650_v5 = vld [vmem:[%s605_s20] sm:$0xff]  ;;  %s1952_s3 = smov 16   ;;  %s2532_s20 = sld [smem:[#allocation23_spill]]  ;;  %vm712_vm2 = vcmask 130048  }
  0x51   : > { %s1953_s1 = smov 64   ;;  %v823_v58 = vshrl.u32 %v822_v55, 7  ;;  %v828_v60 = vand.u32 127, %v822_v55  ;;  %p1625_p10 = scmp.ne.s32.totalorder %s1930_s14, 1 }
  0x52   : > { %674 = vmatpush.msra.mxu0 %v652_v3  ;;  %1642 = vmatpush.msra.mxu2 %v652_v3  ;;  %s2535_s17 = sld [smem:[#allocation29_spill]] (!%p1625_p10) }
  0x53   : > { %v829_v61 = vand.u32 15, %v823_v58  ;;  %v824_v62 = vadd.s32 8, %v823_v58 }
  0x54   : > { %675 = vmatpush.msra.mxu0 %v651_v4  ;;  %1643 = vmatpush.msra.mxu2 %v651_v4  ;;  %v2195_v6 = vld [vmem:[#allocation2] sm:$0xff] }
  0x55   : > { %v2197_v7 = vld [vmem:[#allocation2 + $0x8] sm:$0xff]  ;;  %vm833_vm3 = vcmp.le.s32.totalorder %v828_v60, %v829_v61  ;;  %v830_v2 = vand.u32 15, %v824_v62 }
  0x56   : > { %676 = vmatpush.msra.mxu0 %v650_v5  ;;  %1644 = vmatpush.msra.mxu2 %v650_v5  ;;  %v647_v12 = vld [vmem:[%s2532_s20 + $0x8] sm:$0xff]  ;;  %v646_v21 = vld [vmem:[%s2532_s20] sm:$0xff]  ;;  %v648_v47 = vld [vmem:[%s2532_s20 + $0x10] sm:$0xff] }
  0x57   : > { %1605 = vmatmul.msk.f32.vlgmr.msra.gmra.mxu0 %vm654_vm1, %v2195_v6  ;;  %1606 = vmatmul.msk.f32.vlgmr.msra.gmra.mxu2 %vm654_vm1, %v2197_v7  ;;  %v649_v52 = vld [vmem:[%s2532_s20 + $0x18] sm:$0xff]  ;;  %vm834_vm4 = vcmp.le.s32.totalorder %v828_v60, %v830_v2 }
  0xd4   : > { %v678_v8 = vpop.f32.mrf.mxu0 }
  0xd5   : > { %692 = vrot.lane.b32.xlu1 %v678_v8, %s1950_s0  ;;  %686 = vrot.lane.b32.xlu0 %v678_v8, %s1951_s2 }
  0xda   : > { %v681_v9 = vpop.f32.mrf.mxu2 }
  0xdb   : > { %694 = vrot.lane.b32.xlu2 %v681_v9, %s1950_s0 }
  0xdd   : > { %702 = vrot.lane.b32.xlu1 %v678_v8, %s1952_s3  ;;  %688 = vrot.lane.b32.xlu0 %v681_v9, %s1951_s2 }
  0xe3   : > { %704 = vrot.lane.b32.xlu2 %v681_v9, %s1952_s3 }
 0x135   : > { %v695_v10 = vpop.permute.xlu2 %694 }
 0x136   : > { %v699_v11 = vadd.f32 %v695_v10, %v681_v9  ;;  %v826_v10 = vadd.s32 24, %v823_v58 }
 0x138   : > { %v701_v15 = vmul.f32 %v699_v11, %v647_v12 }
 0x13d   : > { %v705_v13 = vpop.permute.xlu2 %704 }
 0x13e   : > { %v709_v14 = vsub.f32 %v681_v9, %v705_v13 }
 0x140   : > { %v711_v16 = vmul.f32 %v709_v14, %v647_v12 }
 0x142   : > { %v714_v17 = vsel %vm712_vm2, %v701_v15, %v711_v16 }
 0x143   : > { %1607 = vmatpush.xpose.msk.msra.mxu1 %vm654_vm1, %v714_v17 }
 0x147   : > { %v693_v18 = vpop.permute.xlu1 %692  ;;  %v687_v19 = vpop.permute.xlu0 %686 }
 0x148   : > { %743 = vrot.lane.b32.xlu1 %v687_v19, %s1952_s3  ;;  %715 = vrot.lane.b32.xlu0 %v687_v19, %s1950_s0  ;;  %v698_v20 = vadd.f32 %v693_v18, %v678_v8 }
 0x14a   : > { %v700_v25 = vmul.f32 %v698_v20, %v646_v21 }
 0x14f   : > { %v703_v22 = vpop.permute.xlu1 %702  ;;  %v689_v23 = vpop.permute.xlu0 %688 }
 0x150   : > { %v708_v24 = vsub.f32 %v678_v8, %v703_v22  ;;  %727 = vrot.lane.b32.xlu1 %v698_v20, %s1953_s1  ;;  %911 = vmatpush.msrb.mxu2 %v689_v23  ;;  %v825_v8 = vadd.s32 16, %v823_v58 }
 0x151   : > { %745 = vrot.lane.b32.xlu0 %v689_v23, %s1952_s3  ;;  %717 = vrot.lane.b32.xlu2 %v689_v23, %s1950_s0 }
 0x152   : > { %v710_v26 = vmul.f32 %v708_v24, %v646_v21  ;;  %912 = vmatpush.msrb.mxu2 %v687_v19  ;;  %v831_v9 = vand.u32 15, %v825_v8 }
 0x154   : > { %v713_v27 = vsel %vm712_vm2, %v700_v25, %v710_v26  ;;  %vm835_vm5 = vcmp.le.s32.totalorder %v828_v60, %v831_v9 }
 0x155   : > { %1608 = vmatpush.xpose.msk.msra.mxu1 %vm654_vm1, %v713_v27 }
 0x158   : > { %757 = vrot.lane.b32.xlu1 %v709_v14, %s1953_s1  ;;  %v832_v14 = vand.u32 15, %v826_v10 }
 0x159   : > { %729 = vrot.lane.b32.xlu0 %v699_v11, %s1953_s1  ;;  %755 = vrot.lane.b32.xlu2 %v708_v24, %s1953_s1 }
 0x15a   : > { %vm836_vm6 = vcmp.le.s32.totalorder %v828_v60, %v832_v14 }
 0x1ab   : > { %v718_v28 = vpop.permute.xlu2 %717 }
 0x1ac   : > { %v722_v29 = vadd.f32 %v718_v28, %v689_v23 }
 0x1ae   : > { %733 = vrot.lane.b32.xlu1 %v722_v29, %s1953_s1 }
 0x1b3   : > { %v756_v34 = vpop.permute.xlu2 %755 }
 0x1b4   : > { %v767_v36 = vmul.f32 %v756_v34, %v646_v21 }
 0x1ba   : > { %v744_v30 = vpop.permute.xlu1 %743  ;;  %v716_v31 = vpop.permute.xlu0 %715 }
 0x1bb   : > { %v749_v32 = vsub.f32 %v687_v19, %v744_v30  ;;  %v721_v33 = vadd.f32 %v716_v31, %v687_v19 }
 0x1bd   : > { %759 = vrot.lane.b32.xlu0 %v749_v32, %s1953_s1  ;;  %731 = vrot.lane.b32.xlu2 %v721_v33, %s1953_s1 }
 0x1c2   : > { %v728_v35 = vpop.permute.xlu1 %727 }
 0x1c3   : > { %v739_v37 = vmul.f32 %v728_v35, %v646_v21  ;;  %v746_v38 = vpop.permute.xlu0 %745 }
 0x1c4   : > { %v750_v39 = vsub.f32 %v689_v23, %v746_v38 }
 0x1c5   : > { %v771_v40 = vsel %vm712_vm2, %v739_v37, %v767_v36 }
 0x1c6   : > { %761 = vrot.lane.b32.xlu2 %v750_v39, %s1953_s1  ;;  %1609 = vmatmul.msk.f32.vlgmr.msra.gmra.mxu1 %vm654_vm1, %v771_v40 }
 0x1ca   : > { %v758_v41 = vpop.permute.xlu1 %757 }
 0x1cb   : > { %v768_v42 = vmul.f32 %v758_v41, %v647_v12  ;;  %v730_v43 = vpop.permute.xlu0 %729 }
 0x1cc   : > { %v740_v44 = vmul.f32 %v730_v43, %v647_v12 }
 0x1ce   : > { %v772_v45 = vsel %vm712_vm2, %v740_v44, %v768_v42  ;;  %v929_v44 = vld [vmem:[%s2162_s6 + $0x18] sm:$0xff] }
 0x1cf   : > { %1610 = vmatmul.msk.f32.gmra.mxu1 %vm654_vm1, %v772_v45  ;;  %v928_v45 = vld [vmem:[%s2162_s6 + $0x10] sm:$0xff]  ;;  %981 = vmatpush.msrb.mxu0 %v929_v44 }
 0x1d0   : > { %v1094_v44 = vld [vmem:[%s2136_s19 + $0x80] sm:$0xff] }
 0x1d1   : > { %982 = vmatpush.msrb.mxu0 %v928_v45  ;;  %v1095_v45 = vld [vmem:[%s2136_s19 + $0x88] sm:$0xff] }
 0x217   : > { %v732_v46 = vpop.permute.xlu2 %731 }
 0x218   : > { %v741_v49 = vmul.f32 %v732_v46, %v648_v47  ;;  %v927_v46 = vld [vmem:[%s2162_s6 + $0x8] sm:$0xff] }
 0x219   : > { %983 = vmatpush.msrb.mxu0 %v927_v46 }
 0x220   : > { %v734_v53 = vpop.permute.xlu1 %733  ;;  %v762_v54 = vpop.permute.xlu2 %761 }
 0x221   : > { %v742_v56 = vmul.f32 %v734_v53, %v649_v52  ;;  %v770_v57 = vmul.f32 %v762_v54, %v649_v52  ;;  %v933_v52 = vld [vmem:[%s2162_s6 + $0x38] sm:$0xff]  ;;  %v932_v53 = vld [vmem:[%s2162_s6 + $0x30] sm:$0xff]  ;;  %v931_v54 = vld [vmem:[%s2162_s6 + $0x28] sm:$0xff] }
 0x222   : > { %952 = vmatpush.msra.mxu3 %v933_v52  ;;  %v1091_v52 = vld [vmem:[%s2136_s19 + $0x68] sm:$0xff] }
 0x223   : > { %v774_v59 = vsel %vm712_vm2, %v742_v56, %v770_v57 }
 0x224   : > { %953 = vmatpush.msra.mxu3 %v932_v53 }
 0x226   : > { %954 = vmatpush.msra.mxu3 %v931_v54 }
 0x22f   : > { %v760_v48 = vpop.permute.xlu0 %759 }
 0x230   : > { %v769_v50 = vmul.f32 %v760_v48, %v648_v47  ;;  %v926_v48 = vld [vmem:[%s2162_s6] sm:$0xff] }
 0x231   : > { %984 = vmatpush.msrb.mxu0 %v926_v48  ;;  %v1093_v48 = vld [vmem:[%s2136_s19 + $0x78] sm:$0xff] }
 0x232   : > { %v773_v51 = vsel %vm712_vm2, %v741_v49, %v769_v50 }
 0x233   : > { %1611 = vmatmul.msk.f32.gmra.mxu1 %vm654_vm1, %v773_v51 }
 0x23b   : > { %1612 = vmatmul.msk.f32.gmra.mxu1 %vm654_vm1, %v774_v59  ;;  %v930_v59 = vld [vmem:[%s2162_s6 + $0x20] sm:$0xff] }
 0x23c   : > { %955 = vmatpush.msra.mxu3 %v930_v59 }
 0x243   : > { %v810_v63 = vpop.f32.mrf.mxu1 }
 0x244   : > { %v837_v0 = vsel %vm833_vm3, %v810_v63, -inf }
 0x245   : > { %v841_v1 = vsel %vm712_vm2, %v837_v0, -inf }
 0x246   : > { %842 = vmax.xlane.f32.xlu0 %v841_v1 }
 0x24c   : > { %v813_v3 = vpop.f32.mrf.mxu1 }
 0x24d   : > { %v838_v4 = vsel %vm834_vm4, %v813_v3, -inf }
 0x24e   : > { %v844_v5 = vsel %vm712_vm2, %v838_v4, -inf }
 0x24f   : > { %845 = vmax.xlane.f32.xlu1 %v844_v5 }
 0x2b0   : > { %v816_v11 = vpop.f32.mrf.mxu1 }
 0x2b1   : > { %v839_v12 = vsel %vm835_vm5, %v816_v11, -inf  ;;  %v1954_v11 = vmov 32.0  }
 0x2b2   : > { %v847_v13 = vsel %vm712_vm2, %v839_v12, -inf }
 0x2b3   : > { %848 = vmax.xlane.f32.xlu2 %v847_v13 }
 0x2b8   : > { %v819_v15 = vpop.f32.mrf.mxu1 }
 0x2b9   : > { %v840_v16 = vsel %vm836_vm6, %v819_v15, -inf  ;;  %v843_v17 = vpop.xlane.xlu0 %842  ;;  %v1044_v15 = vld [vmem:[%s2167_s18 + $0x18] sm:$0xff] }
 0x2ba   : > { %v853_v18 = vsub.f32 %v837_v0, %v843_v17  ;;  %v850_v19 = vsel %vm712_vm2, %v840_v16, -inf  ;;  %1067 = vmatpush.msrb.mxu3 %v1044_v15  ;;  %v1042_v17 = vld [vmem:[%s2167_s18 + $0x8] sm:$0xff]  ;;  %v1079_v15 = vld [vmem:[%s2136_s19 + $0x8] sm:$0xff] }
 0x2bb   : > { %851 = vmax.xlane.f32.xlu2 %v850_v19  ;;  %v1041_v19 = vld [vmem:[%s2167_s18] sm:$0xff] }
 0x2bc   : > { %v857_v20 = vmul.f32 1.442695, %v853_v18 }
 0x2be   : > { %1763 = vpow2.f32 %v857_v20 }
 0x2c2   : > { %v846_v21 = vpop.xlane.xlu1 %845 }
 0x2c3   : > { %v854_v22 = vsub.f32 %v838_v4, %v846_v21 }
 0x2c4   : > { %v1764_v23 = vpop.eup %1763 }
 0x2c5   : > { %v859_v24 = vmul.f32 1.442695, %v854_v22  ;;  %v865_v25 = vsel %vm712_vm2, %v1764_v23, 0.0 }
 0x2c6   : > { %866 = vadd.xlane.f32.xlu0 %v865_v25  ;;  %v1109_v25 = vld [vmem:[%s2136_s19 + $0xf8] sm:$0xff] }
 0x2c7   : > { %1765 = vpow2.f32 %v859_v24  ;;  %v1108_v24 = vld [vmem:[%s2136_s19 + $0xf0] sm:$0xff]  ;;  %1133 = vmatpush.msrb.mxu1 %v1109_v25  ;;  %v1228_v25 = vld [vmem:[%s2177_s11 + $0x50] sm:$0xff] }
 0x2c8   : > { %1110 = vmatpush.msra.mxu2 %v1108_v24  ;;  %v1229_v24 = vld [vmem:[%s2177_s11 + $0x58] sm:$0xff] }
 0x2cd   : > { %v1766_v26 = vpop.eup %1765 }
 0x2ce   : > { %v868_v27 = vsel %vm712_vm2, %v1766_v26, 0.0 }
 0x2cf   : > { %869 = vadd.xlane.f32.xlu1 %v868_v27  ;;  %v1107_v27 = vld [vmem:[%s2136_s19 + $0xe8] sm:$0xff] }
 0x2d0   : > { %1134 = vmatpush.msrb.mxu1 %v1107_v27  ;;  %v1226_v27 = vld [vmem:[%s2177_s11 + $0x40] sm:$0xff] }
 0x326   : > { %v849_v28 = vpop.xlane.xlu2 %848 }
 0x327   : > { %v855_v29 = vsub.f32 %v839_v12, %v849_v28  ;;  %v1104_v28 = vld [vmem:[%s2136_s19 + $0xd0] sm:$0xff] }
 0x329   : > { %v861_v30 = vmul.f32 1.442695, %v855_v29  ;;  %v1105_v29 = vld [vmem:[%s2136_s19 + $0xd8] sm:$0xff] }
 0x32a   : > { %1135 = vmatpush.msrb.mxu1 %v1105_v29 }
 0x32b   : > { %1767 = vpow2.f32 %v861_v30  ;;  %v1102_v30 = vld [vmem:[%s2136_s19 + $0xc0] sm:$0xff] }
 0x32e   : > { %v852_v31 = vpop.xlane.xlu2 %851 }
 0x32f   : > { %v856_v32 = vsub.f32 %v840_v16, %v852_v31  ;;  %v1103_v31 = vld [vmem:[%s2136_s19 + $0xc8] sm:$0xff] }
 0x330   : > { %1136 = vmatpush.msrb.mxu1 %v1103_v31  ;;  %v1224_v31 = vld [vmem:[%s2177_s11 + $0x30] sm:$0xff] }
 0x331   : > { %v1768_v33 = vpop.eup %1767  ;;  %v863_v34 = vmul.f32 1.442695, %v856_v32 }
 0x332   : > { %v871_v35 = vsel %vm712_vm2, %v1768_v33, 0.0 }
 0x333   : > { %1769 = vpow2.f32 %v863_v34  ;;  %872 = vadd.xlane.f32.xlu2 %v871_v35  ;;  %v1100_v34 = vld [vmem:[%s2136_s19 + $0xb0] sm:$0xff]  ;;  %v1101_v35 = vld [vmem:[%s2136_s19 + $0xb8] sm:$0xff] }
 0x334   : > { %1137 = vmatpush.msrb.mxu1 %v1101_v35  ;;  %v1222_v35 = vld [vmem:[%s2177_s11 + $0x20] sm:$0xff] }
 0x339   : > { %v1770_v36 = vpop.eup %1769  ;;  %v867_v37 = vpop.xlane.xlu0 %866 }
 0x33a   : > { %1771 = vrcp.f32 %v867_v37  ;;  %v874_v38 = vsel %vm712_vm2, %v1770_v36, 0.0 }
 0x33b   : > { %875 = vadd.xlane.f32.xlu0 %v874_v38  ;;  %v1098_v38 = vld [vmem:[%s2136_s19 + $0xa0] sm:$0xff] }
 0x340   : > { %v1772_v39 = vpop.eup %1771 }
 0x341   : > { %v881_v40 = vmul.f32 %v1772_v39, %v1764_v23  ;;  %v1099_v39 = vld [vmem:[%s2136_s19 + $0xa8] sm:$0xff] }
 0x342   : > { %v870_v41 = vpop.xlane.xlu1 %869  ;;  %1138 = vmatpush.msrb.mxu1 %v1099_v39 }
 0x343   : > { %1773 = vrcp.f32 %v870_v41  ;;  %1613 = vmatmul.msk.f32.vlgmr.msrb.gmra.mxu2 %vm712_vm2, %v881_v40  ;;  %v1096_v41 = vld [vmem:[%s2136_s19 + $0x90] sm:$0xff] }
 0x349   : > { %v1774_v42 = vpop.eup %1773 }
 0x34a   : > { %v882_v43 = vmul.f32 %v1774_v42, %v1766_v26  ;;  %v1106_v26 = vld [vmem:[%s2136_s19 + $0xe0] sm:$0xff]  ;;  %v1097_v42 = vld [vmem:[%s2136_s19 + $0x98] sm:$0xff] }
 0x34b   : > { %1111 = vmatpush.msra.mxu2 %v1106_v26  ;;  %1139 = vmatpush.msrb.mxu1 %v1097_v42  ;;  %v1227_v26 = vld [vmem:[%s2177_s11 + $0x48] sm:$0xff]  ;;  %v1220_v42 = vld [vmem:[%s2177_s11 + $0x10] sm:$0xff] }
 0x34c   : > { %1614 = vmatmul.msk.f32.gmra.mxu2 %vm712_vm2, %v882_v43 }
 0x34d   : > { %1112 = vmatpush.msra.mxu2 %v1104_v28  ;;  %1140 = vmatpush.msrb.mxu1 %v1095_v45  ;;  %v1225_v28 = vld [vmem:[%s2177_s11 + $0x38] sm:$0xff]  ;;  %v1219_v45 = vld [vmem:[%s2177_s11 + $0x8] sm:$0xff] }
 0x34f   : > { %1113 = vmatpush.msra.mxu2 %v1102_v30  ;;  %1141 = vmatpush.msrb.mxu1 %v1093_v48 }
 0x351   : > { %1114 = vmatpush.msra.mxu2 %v1100_v34  ;;  %1142 = vmatpush.msrb.mxu1 %v1091_v52 }
 0x353   : > { %1115 = vmatpush.msra.mxu2 %v1098_v38  ;;  %v1221_v38 = vld [vmem:[%s2177_s11 + $0x18] sm:$0xff] }
 0x355   : > { %1116 = vmatpush.msra.mxu2 %v1096_v41 }
 0x357   : > { %1117 = vmatpush.msra.mxu2 %v1094_v44 }
 0x3a6   : > { %v873_v47 = vpop.xlane.xlu2 %872 }
 0x3a7   : > { %1775 = vrcp.f32 %v873_v47  ;;  %v1092_v47 = vld [vmem:[%s2136_s19 + $0x70] sm:$0xff] }
 0x3a8   : > { %1118 = vmatpush.msra.mxu2 %v1092_v47 }
 0x3ad   : > { %v1776_v49 = vpop.eup %1775 }
 0x3ae   : > { %v876_v50 = vpop.xlane.xlu0 %875  ;;  %v883_v51 = vmul.f32 %v1776_v49, %v1768_v33 }
 0x3af   : > { %1777 = vrcp.f32 %v876_v50 }
 0x3b0   : > { %1615 = vmatmul.msk.f32.gmra.mxu2 %vm712_vm2, %v883_v51  ;;  %1779 = vrcp.f32 %v1954_v11  ;;  %v1090_v51 = vld [vmem:[%s2136_s19 + $0x60] sm:$0xff] }
 0x3b1   : > { %1119 = vmatpush.msra.mxu2 %v1090_v51 }
 0x3b5   : > { %v1778_v55 = vpop.eup %1777 }
 0x3b6   : > { %v884_v56 = vmul.f32 %v1778_v55, %v1770_v36  ;;  %v1780_v12 = vpop.eup %1779  ;;  %v2300_v55 = vld [vmem:[%s634_s28] ss:$0 sm:$0xff] }
 0x3b7   : > { %v1004_v13 = vmul.f32 32.0, %v1780_v12  ;;  %vm1008_vm7 = vweird.f32 %v1780_v12 }
 0x3b8   : > { %1616 = vmatmul.msk.f32.gmra.mxu2 %vm712_vm2, %v884_v56  ;;  %v1088_v56 = vld [vmem:[%s2136_s19 + $0x50] sm:$0xff] }
 0x3b9   : > { %v1005_v14 = vsub.f32 1.0, %v1004_v13  ;;  %1120 = vmatpush.msra.mxu2 %v1088_v56  ;;  %v1081_v13 = vld [vmem:[%s2136_s19 + $0x18] sm:$0xff] }
 0x3bb   : > { %v1006_v16 = vmul.f32 %v1780_v12, %v1005_v14  ;;  %v1078_v14 = vld [vmem:[%s2136_s19] sm:$0xff] }
 0x3bd   : > { %v1007_v18 = vadd.f32 %v1780_v12, %v1006_v16 }
 0x3bf   : > { %v2271_v20 = vsel %vm1008_vm7, %v1780_v12, %v1007_v18 }
 0x3c6   : > { %v914_v57 = vpop.f32.mrf.mxu2 }
 0x3c7   : > { %1619 = vmatmul.msk.f32.vlgmr.msrb.gmra.mxu0 %vm654_vm1, %v914_v57  ;;  %v1089_v57 = vld [vmem:[%s2136_s19 + $0x58] sm:$0xff] }
 0x3c8   : > { %1143 = vmatpush.msrb.mxu1 %v1089_v57 }
 0x3cf   : > { %v917_v58 = vpop.f32.mrf.mxu2 }
 0x3d0   : > { %1620 = vmatmul.msk.f32.gmra.mxu0 %vm654_vm1, %v917_v58 }
 0x433   : > { %v920_v60 = vpop.f32.mrf.mxu2 }
 0x434   : > { %1617 = vmatmul.msk.f32.vlgmr.msra.gmra.mxu3 %vm654_vm1, %v920_v60 }
 0x43b   : > { %v923_v61 = vpop.f32.mrf.mxu2 }
 0x43c   : > { %1618 = vmatmul.msk.f32.gmra.mxu3 %vm654_vm1, %v923_v61  ;;  %v1086_v61 = vld [vmem:[%s2136_s19 + $0x40] sm:$0xff] }
 0x43d   : > { %1121 = vmatpush.msra.mxu2 %v1086_v61 }
 0x444   : > { %v986_v62 = vpop.f32.mrf.mxu0 }
 0x44d   : > { %v989_v4 = vpop.f32.mrf.mxu0 }
 0x4b7   : > { %v957_v63 = vpop.f32.mrf.mxu3 }
 0x4b8   : > { %v987_v0 = vadd.f32 %v986_v62, %v957_v63  ;;  %v1087_v62 = vld [vmem:[%s2136_s19 + $0x48] sm:$0xff] }
 0x4b9   : > { %1144 = vmatpush.msrb.mxu1 %v1087_v62 }
 0x4ba   : > { %v2256_v1 = vadd.f32 %v987_v0, %v2195_v6 }
 0x4bc   : > { %v995_v2 = vmul.f32 %v2256_v1, %v2256_v1 }
 0x4be   : > { %v997_v3 = vsel %vm654_vm1, %v995_v2, 0.0  ;;  %v1084_v2 = vld [vmem:[%s2136_s19 + $0x30] sm:$0xff] }
 0x4bf   : > { %998 = vadd.xlane.f32.xlu1 %v997_v3  ;;  %v960_v5 = vpop.f32.mrf.mxu3  ;;  %v1085_v3 = vld [vmem:[%s2136_s19 + $0x38] sm:$0xff]  ;;  %1122 = vmatpush.msra.mxu2 %v1084_v2 }
 0x4c0   : > { %v990_v8 = vadd.f32 %v989_v4, %v960_v5  ;;  %v1083_v5 = vld [vmem:[%s2136_s19 + $0x28] sm:$0xff]  ;;  %1145 = vmatpush.msrb.mxu1 %v1085_v3 }
 0x4c2   : > { %v2262_v9 = vadd.f32 %v990_v8, %v2197_v7  ;;  %v1043_v7 = vld [vmem:[%s2167_s18 + $0x10] sm:$0xff]  ;;  %1146 = vmatpush.msrb.mxu1 %v1083_v5 }
 0x4c3   : > { %1068 = vmatpush.msrb.mxu3 %v1043_v7 }
 0x4c4   : > { %v996_v10 = vmul.f32 %v2262_v9, %v2262_v9  ;;  %1147 = vmatpush.msrb.mxu1 %v1081_v13 }
 0x4c5   : > { %1069 = vmatpush.msrb.mxu3 %v1042_v17 }
 0x4c6   : > { %v1000_v6 = vsel %vm654_vm1, %v996_v10, 0.0  ;;  %v1080_v10 = vld [vmem:[%s2136_s19 + $0x10] sm:$0xff]  ;;  %1148 = vmatpush.msrb.mxu1 %v1079_v15 }
 0x4c7   : > { %1001 = vadd.xlane.f32.xlu2 %v1000_v6  ;;  %1070 = vmatpush.msrb.mxu3 %v1041_v19  ;;  %v1233_v19 = vld [vmem:[%s2177_s11 + $0x78] sm:$0xff]  ;;  %v1269_v15 = vld [vmem:[%s2182_s10 + $0x60] sm:$0xff] }
 0x4c8   : > { %1234 = vmatpush.msra.mxu0 %v1233_v19 }
 0x532   : > { %v999_v21 = vpop.xlane.xlu1 %998 }
 0x533   : > { %v1010_v22 = vmul.f32 %v2271_v20, %v999_v21  ;;  %v1232_v21 = vld [vmem:[%s2177_s11 + $0x70] sm:$0xff] }
 0x534   : > { %1235 = vmatpush.msra.mxu0 %v1232_v21  ;;  %v1267_v21 = vld [vmem:[%s2182_s10 + $0x50] sm:$0xff] }
 0x535   : > { %v1012_v23 = vadd.f32 1e-06, %v1010_v22  ;;  %v1231_v22 = vld [vmem:[%s2177_s11 + $0x68] sm:$0xff] }
 0x536   : > { %1236 = vmatpush.msra.mxu0 %v1231_v22 }
 0x537   : > { %1781 = vrsqrt.f32 %v1012_v23  ;;  %vm1020_vm9 = vweird.f32 %v1012_v23 }
 0x53a   : > { %v1002_v32 = vpop.xlane.xlu2 %1001 }
 0x53b   : > { %v1011_v33 = vmul.f32 %v2271_v20, %v1002_v32 }
 0x53d   : > { %v1782_v36 = vpop.eup %1781  ;;  %v1013_v37 = vadd.f32 1e-06, %v1011_v33  ;;  %v1223_v33 = vld [vmem:[%s2177_s11 + $0x28] sm:$0xff] }
 0x53e   : > { %v1015_v40 = vmul.f32 %v1782_v36, %v1012_v23  ;;  %vm1021_vm8 = vweird.f32 %v1782_v36  ;;  %v1230_v23 = vld [vmem:[%s2177_s11 + $0x60] sm:$0xff] }
 0x53f   : > { %1783 = vrsqrt.f32 %v1013_v37  ;;  %vm1022_vm10 = vmor %vm1020_vm9, %vm1021_vm8  ;;  %vm1030_vm12 = vweird.f32 %v1013_v37  ;;  %1237 = vmatpush.msra.mxu0 %v1230_v23 }
 0x540   : > { %v1016_v43 = vmul.f32 %v1782_v36, %v1015_v40 }
 0x541   : > { %1238 = vmatpush.msra.mxu0 %v1229_v24 }
 0x542   : > { %v1017_v46 = vmul.f32 0.5, %v1016_v43 }
 0x543   : > { %1239 = vmatpush.msra.mxu0 %v1228_v25  ;;  %v1266_v25 = vld [vmem:[%s2182_s10 + $0x48] sm:$0xff] }
 0x544   : > { %v1018_v49 = vsub.f32 1.5, %v1017_v46 }
 0x545   : > { %v1784_v50 = vpop.eup %1783  ;;  %1240 = vmatpush.msra.mxu0 %v1227_v26 }
 0x546   : > { %v1019_v53 = vmul.f32 %v1782_v36, %v1018_v49  ;;  %v1025_v54 = vmul.f32 %v1784_v50, %v1013_v37  ;;  %vm1031_vm11 = vweird.f32 %v1784_v50  ;;  %v1218_v49 = vld [vmem:[%s2177_s11] sm:$0xff] }
 0x547   : > { %vm1032_vm13 = vmor %vm1030_vm12, %vm1031_vm11  ;;  %1241 = vmatpush.msra.mxu0 %v1226_v27  ;;  %v1265_v27 = vld [vmem:[%s2182_s10 + $0x40] sm:$0xff] }
 0x548   : > { %v1023_v58 = vsel %vm1022_vm10, %v1782_v36, %v1019_v53  ;;  %v1026_v59 = vmul.f32 %v1784_v50, %v1025_v54 }
 0x549   : > { %v1034_v60 = vmul.f32 %v1023_v58, %v2256_v1  ;;  %v1082_v1 = vld [vmem:[%s2136_s19 + $0x20] sm:$0xff]  ;;  %1242 = vmatpush.msra.mxu0 %v1225_v28 }
 0x54a   : > { %v1027_v63 = vmul.f32 0.5, %v1026_v59  ;;  %1123 = vmatpush.msra.mxu2 %v1082_v1  ;;  %v1271_v1 = vld [vmem:[%s2182_s10 + $0x70] sm:$0xff] }
 0x54b   : > { %v2308_v0 = vmul.f32 %v2300_v55, %v1034_v60  ;;  %1243 = vmatpush.msra.mxu0 %v1224_v31 }
 0x54c   : > { %v1028_v4 = vsub.f32 1.5, %v1027_v63  ;;  %1124 = vmatpush.msra.mxu2 %v1080_v10 }
 0x54d   : > { %1621 = vmatmul.msk.f32.vlgmr.msrb.gmra.mxu3 %vm654_vm1, %v2308_v0  ;;  %1244 = vmatpush.msra.mxu0 %v1223_v33 }
 0x54e   : > { %v1029_v8 = vmul.f32 %v1784_v50, %v1028_v4  ;;  %1125 = vmatpush.msra.mxu2 %v1078_v14  ;;  %v1272_v4 = vld [vmem:[%s2182_s10 + $0x78] sm:$0xff] }
 0x54f   : > { %1245 = vmatpush.msra.mxu0 %v1222_v35  ;;  %1277 = vmatpush.msra.mxu3 %v1272_v4 }
 0x550   : > { %v1033_v6 = vsel %vm1032_vm13, %v1784_v50, %v1029_v8 }
 0x551   : > { %v1035_v11 = vmul.f32 %v1033_v6, %v2262_v9  ;;  %v1761_v9 = vld [vmem:[%s618_s30] ss:$0 sm:$0xff]  ;;  %1246 = vmatpush.msra.mxu0 %v1221_v38  ;;  %1278 = vmatpush.msra.mxu3 %v1271_v1 }
 0x553   : > { %v2319_v12 = vmul.f32 %v2300_v55, %v1035_v11  ;;  %1247 = vmatpush.msra.mxu0 %v1220_v42  ;;  %v1270_v11 = vld [vmem:[%s2182_s10 + $0x68] sm:$0xff] }
 0x554   : > { %1279 = vmatpush.msra.mxu3 %v1270_v11  ;;  %v1262_v42 = vld [vmem:[%s2182_s10 + $0x28] sm:$0xff] }
 0x555   : > { %1622 = vmatmul.msk.f32.gmra.mxu3 %vm654_vm1, %v2319_v12  ;;  %1248 = vmatpush.msra.mxu0 %v1219_v45 }
 0x556   : > { %1280 = vmatpush.msra.mxu3 %v1269_v15 }
 0x557   : > { %1249 = vmatpush.msra.mxu0 %v1218_v49 }
 0x5d0   : > { %v1072_v16 = vpop.f32.mrf.mxu3 }
 0x5d1   : > { %v1073_v7 = vadd.f32 %v1761_v9, %v1072_v16 }
 0x5d3   : > { %1126 = vmatmul.f32.vlgmr.msra.gmra.mxu2 %v1073_v7  ;;  %1149 = vmatmul.f32.vlgmr.msrb.gmra.mxu1 %v1073_v7 }
 0x5d8   : > { %v1075_v17 = vpop.f32.mrf.mxu3 }
 0x5d9   : > { %v1076_v18 = vadd.f32 %v1761_v9, %v1075_v17 }
 0x5db   : > { %1129 = vmatmul.f32.gmra.mxu2 %v1076_v18  ;;  %1152 = vmatmul.f32.gmra.mxu1 %v1076_v18  ;;  %v1268_v18 = vld [vmem:[%s2182_s10 + $0x58] sm:$0xff] }
 0x5dc   : > { %1281 = vmatpush.msra.mxu3 %v1268_v18 }
 0x5de   : > { %1282 = vmatpush.msra.mxu3 %v1267_v21 }
 0x5e0   : > { %1283 = vmatpush.msra.mxu3 %v1266_v25 }
 0x5e2   : > { %1284 = vmatpush.msra.mxu3 %v1265_v27 }
 0x656   : > { %v2340_v29 = vpop.f32.mrf.mxu2 }
 0x657   : > { %v1158_v30 = vmul.f32 0.70710677, %v2340_v29  ;;  %v1156_v38 = vmul.f32 0.5, %v2340_v29 }
 0x659   : > { %v2344_v32 = vclamps-f32 %v1158_v30, 3.832507 }
 0x65b   : > { %v1164_v34 = vmul.f32 %v2344_v32, %v2344_v32 }
 0x65d   : > { %v1166_v36 = vmul.f32 0.00022905065, %v1164_v34  ;;  %v1182_v37 = vmul.f32 -1.1791603e-07, %v1164_v34 }
 0x65e   : > { %v2351_v39 = vpop.f32.mrf.mxu2 }
 0x65f   : > { %v1168_v40 = vadd.f32 0.003408291, %v1166_v36  ;;  %v1184_v41 = vadd.f32 2.3547966e-05, %v1182_v37  ;;  %v1159_v43 = vmul.f32 0.70710677, %v2351_v39 }
 0x660   : > { %v1263_v37 = vld [vmem:[%s2182_s10 + $0x30] sm:$0xff] }
 0x661   : > { %v1186_v44 = vmul.f32 %v1184_v41, %v1164_v34  ;;  %v1170_v46 = vmul.f32 %v1168_v40, %v1164_v34  ;;  %v2356_v47 = vclamps-f32 %v1159_v43, 3.832507 }
 0x663   : > { %v1188_v48 = vadd.f32 0.0010179626, %v1186_v44  ;;  %v1165_v50 = vmul.f32 %v2356_v47, %v2356_v47  ;;  %v1172_v52 = vadd.f32 0.050955694, %v1170_v46  ;;  %v1261_v44 = vld [vmem:[%s2182_s10 + $0x20] sm:$0xff] }
 0x665   : > { %v1190_v51 = vmul.f32 %v1188_v48, %v1164_v34  ;;  %v1167_v53 = vmul.f32 0.00022905065, %v1165_v50  ;;  %v1183_v54 = vmul.f32 -1.1791603e-07, %v1165_v50  ;;  %v1174_v60 = vmul.f32 %v1172_v52, %v1164_v34  ;;  %v1260_v48 = vld [vmem:[%s2182_s10 + $0x18] sm:$0xff] }
 0x667   : > { %v1192_v56 = vadd.f32 0.01407047, %v1190_v51  ;;  %v1169_v57 = vadd.f32 0.003408291, %v1167_v53  ;;  %v1185_v58 = vadd.f32 2.3547966e-05, %v1183_v54 }
 0x668   : > { %v1176_v5 = vadd.f32 0.18520832, %v1174_v60  ;;  %v1157_v51 = vmul.f32 0.5, %v2351_v39  ;;  %v1258_v53 = vld [vmem:[%s2182_s10 + $0x8] sm:$0xff]  ;;  %v1762_v60 = vld [vmem:[%s631_s12] ss:$0 sm:$0xff] }
 0x669   : > { %v1194_v59 = vmul.f32 %v1192_v56, %v1164_v34  ;;  %v1187_v61 = vmul.f32 %v1185_v58, %v1165_v50  ;;  %v1171_v63 = vmul.f32 %v1169_v57, %v1165_v50 }
 0x66a   : > { %v1178_v9 = vmul.f32 %v1176_v5, %v1164_v34 }
 0x66b   : > { %v1196_v62 = vadd.f32 0.11098505, %v1194_v59  ;;  %v1189_v2 = vadd.f32 0.0010179626, %v1187_v61  ;;  %v1173_v6 = vadd.f32 0.050955694, %v1171_v63 }
 0x66c   : > { %v1180_v22 = vadd.f32 1.1283791, %v1178_v9 }
 0x66d   : > { %v1198_v3 = vmul.f32 %v1196_v62, %v1164_v34  ;;  %v1191_v8 = vmul.f32 %v1189_v2, %v1165_v50  ;;  %v1175_v17 = vmul.f32 %v1173_v6, %v1165_v50 }
 0x66e   : > { %v1206_v28 = vmul.f32 %v2344_v32, %v1180_v22  ;;  %v1150_v32 = vpop.f32.mrf.mxu1 }
 0x66f   : > { %v1200_v10 = vadd.f32 0.49746925, %v1198_v3  ;;  %v1193_v13 = vadd.f32 0.01407047, %v1191_v8  ;;  %v1177_v24 = vadd.f32 0.18520832, %v1175_v17 }
 0x671   : > { %v1202_v14 = vmul.f32 %v1200_v10, %v1164_v34  ;;  %v1195_v16 = vmul.f32 %v1193_v13, %v1165_v50  ;;  %v1179_v33 = vmul.f32 %v1177_v24, %v1165_v50  ;;  %v1264_v34 = vld [vmem:[%s2182_s10 + $0x38] sm:$0xff] }
 0x672   : > { %1285 = vmatpush.msra.mxu3 %v1264_v34 }
 0x673   : > { %v1204_v7 = vadd.f32 1.0, %v1202_v14  ;;  %v1197_v19 = vadd.f32 0.11098505, %v1195_v16  ;;  %v1181_v41 = vadd.f32 1.1283791, %v1179_v33 }
 0x674   : > { %1286 = vmatpush.msra.mxu3 %v1263_v37 }
 0x675   : > { %1785 = vrcp.f32 %v1204_v7  ;;  %v1199_v23 = vmul.f32 %v1197_v19, %v1165_v50  ;;  %v1207_v46 = vmul.f32 %v2356_v47, %v1181_v41  ;;  %v1257_v47 = vld [vmem:[%s2182_s10] sm:$0xff] }
 0x676   : > { %1287 = vmatpush.msra.mxu3 %v1262_v42  ;;  %v1153_v56 = vpop.f32.mrf.mxu1 }
 0x677   : > { %v1201_v26 = vadd.f32 0.49746925, %v1199_v23 }
 0x678   : > { %1288 = vmatpush.msra.mxu3 %v1261_v44 }
 0x679   : > { %v1203_v30 = vmul.f32 %v1201_v26, %v1165_v50  ;;  %v1259_v50 = vld [vmem:[%s2182_s10 + $0x10] sm:$0xff]  ;;  %s2534_s10 = sld [smem:[#allocation28_spill]] (!%p1625_p10) }
 0x67a   : > { %1289 = vmatpush.msra.mxu3 %v1260_v48 }
 0x67b   : > { %v1786_v31 = vpop.eup %1785  ;;  %v1205_v36 = vadd.f32 1.0, %v1203_v30 }
 0x67c   : > { %v1210_v35 = vmul.f32 %v1786_v31, %v1206_v28  ;;  %1290 = vmatpush.msra.mxu3 %v1259_v50 }
 0x67d   : > { %1787 = vrcp.f32 %v1205_v36 }
 0x67e   : > { %v1212_v40 = vadd.f32 1.0, %v1210_v35  ;;  %1291 = vmatpush.msra.mxu3 %v1258_v53 }
 0x680   : > { %v1214_v43 = vmul.f32 %v1212_v40, %v1156_v38  ;;  %1292 = vmatpush.msra.mxu3 %v1257_v47 }
 0x682   : > { %v1216_v45 = vmul.f32 %v1214_v43, %v1150_v32 }
 0x683   : > { %v1788_v49 = vpop.eup %1787 }
 0x684   : > { %1250 = vmatmul.f32.vlgmr.msra.gmra.mxu0 %v1216_v45  ;;  %v1211_v29 = vmul.f32 %v1788_v49, %v1207_v46 }
 0x686   : > { %v1213_v52 = vadd.f32 1.0, %v1211_v29 }
 0x688   : > { %v1215_v54 = vmul.f32 %v1213_v52, %v1157_v51 }
 0x68a   : > { %v1217_v57 = vmul.f32 %v1215_v54, %v1153_v56 }
 0x68c   : > { %1253 = vmatmul.f32.gmra.mxu0 %v1217_v57 }
 0x701   : > { %v1251_v58 = vpop.f32.mrf.mxu0 }
 0x702   : > { %1293 = vmatmul.f32.vlgmr.msra.gmra.mxu3 %v1251_v58 }
 0x709   : > { %v1254_v59 = vpop.f32.mrf.mxu0 }
 0x70a   : > { %1296 = vmatmul.f32.gmra.mxu3 %v1254_v59 }
 0x785   : > { %v1294_v39 = vpop.f32.mrf.mxu3 }
 0x786   : > { %v1295_v61 = vadd.f32 %v1762_v60, %v1294_v39 }
 0x788   : > { %v1300_v62 = vadd.f32 %v1295_v61, %v2308_v0 }
 0x78a   : > { %v1302_v63 = vmul.f32 %v1300_v62, %v1300_v62 }
 0x78c   : > { %v1304_v2 = vsel %vm654_vm1, %v1302_v63, 0.0 }
 0x78d   : > { %1305 = vadd.xlane.f32.xlu0 %v1304_v2  ;;  %v1297_v3 = vpop.f32.mrf.mxu3 }
 0x78e   : > { %v1298_v4 = vadd.f32 %v1762_v60, %v1297_v3 }
 0x790   : > { %v1301_v1 = vadd.f32 %v1298_v4, %v2319_v12 }
 0x792   : > { %v1303_v5 = vmul.f32 %v1301_v1, %v1301_v1 }
 0x794   : > { %v1307_v8 = vsel %vm654_vm1, %v1303_v5, 0.0 }
 0x795   : > { %1308 = vadd.xlane.f32.xlu1 %v1307_v8 }
 0x800   : > { %v1306_v10 = vpop.xlane.xlu0 %1305 }
 0x801   : > { %v1310_v6 = vmul.f32 %v1306_v10, %v2271_v20 }
 0x803   : > { %v1312_v11 = vadd.f32 1e-06, %v1310_v6 }
 0x805   : > { %1789 = vrsqrt.f32 %v1312_v11  ;;  %vm1320_vm15 = vweird.f32 %v1312_v11 }
 0x808   : > { %v1309_v13 = vpop.xlane.xlu1 %1308 }
 0x809   : > { %v1311_v0 = vmul.f32 %v1309_v13, %v2271_v20 }
 0x80b   : > { %v1790_v14 = vpop.eup %1789  ;;  %v1313_v9 = vadd.f32 1e-06, %v1311_v0 }
 0x80c   : > { %v1315_v15 = vmul.f32 %v1790_v14, %v1312_v11  ;;  %vm1321_vm14 = vweird.f32 %v1790_v14 }
 0x80d   : > { %1791 = vrsqrt.f32 %v1313_v9  ;;  %vm1322_vm0 = vmor %vm1320_vm15, %vm1321_vm14  ;;  %vm1330_vm3 = vweird.f32 %v1313_v9 }
 0x80e   : > { %v1316_v16 = vmul.f32 %v1790_v14, %v1315_v15 }
 0x810   : > { %v1317_v7 = vmul.f32 0.5, %v1316_v16 }
 0x812   : > { %v1318_v17 = vsub.f32 1.5, %v1317_v7 }
 0x813   : > { %v1792_v12 = vpop.eup %1791 }
 0x814   : > { %v1319_v18 = vmul.f32 %v1790_v14, %v1318_v17  ;;  %v1325_v19 = vmul.f32 %v1792_v12, %v1313_v9  ;;  %vm1331_vm2 = vweird.f32 %v1792_v12 }
 0x815   : > { %vm1332_vm4 = vmor %vm1330_vm3, %vm1331_vm2 }
 0x816   : > { %v1323_v21 = vsel %vm1322_vm0, %v1790_v14, %v1319_v18  ;;  %v1326_v23 = vmul.f32 %v1792_v12, %v1325_v19 }
 0x817   : > { %v1334_v22 = vmul.f32 %v1323_v21, %v1300_v62 }
 0x818   : > { %v1327_v25 = vmul.f32 0.5, %v1326_v23 }
 0x819   : > { %v1336_v24 = vmul.f32 %v2300_v55, %v1334_v22 }
 0x81a   : > { %v1328_v20 = vsub.f32 1.5, %v1327_v25 }
 0x81b   : > { %1338 = vst.msk [vmem:[#allocation2] sm:$0xff] %vm654_vm1, %v1336_v24 }
 0x81c   : > { %v1329_v26 = vmul.f32 %v1792_v12, %v1328_v20 }
 0x81e   : > { %v1333_v27 = vsel %vm1332_vm4, %v1792_v12, %v1329_v26 }
 0x81f   : > { %v1335_v28 = vmul.f32 %v1333_v27, %v1301_v1  ;;  %1343 = sbr.rel (%p1625_p10) target bundleno = 2222 (0x8ae), region = 84 }
 0x821   : > { %v1337_v30 = vmul.f32 %v2300_v55, %v1335_v28 }
 0x823   : > { %1339 = vst.msk [vmem:[#allocation2 + $0x8] sm:$0xff] %vm654_vm1, %v1337_v30 }
 0x824   : > { %v1347_v31 = vld [vmem:[%s2534_s10 + $0x18] sm:$0xff]  ;;  %v1346_v33 = vld [vmem:[%s2534_s10 + $0x10] sm:$0xff]  ;;  %v1345_v55 = vld [vmem:[%s2534_s10 + $0x8] sm:$0xff] }
 0x825   : > { %1370 = vmatpush.msra.mxu0 %v1347_v31  ;;  %1645 = vmatpush.msra.mxu1 %v1347_v31  ;;  %v1344_v34 = vld [vmem:[%s2534_s10] sm:$0xff] }
 0x826   : > { %v1793_v35 = vld [vmem:[%s2535_s17] ss:$0 sm:$0xff] }
 0x827   : > { %1371 = vmatpush.msra.mxu0 %v1346_v33  ;;  %1646 = vmatpush.msra.mxu1 %v1346_v33 }
 0x829   : > { %1372 = vmatpush.msra.mxu0 %v1345_v55  ;;  %1647 = vmatpush.msra.mxu1 %v1345_v55 }
 0x82b   : > { %1373 = vmatpush.msra.mxu0 %v1344_v34  ;;  %1648 = vmatpush.msra.mxu1 %v1344_v34 }
 0x82c   : > { %1626 = vmatmul.msk.f32.vlgmr.msra.gmra.mxu0 %vm654_vm1, %v1336_v24  ;;  %1627 = vmatmul.msk.f32.vlgmr.msra.gmra.mxu1 %vm654_vm1, %v1337_v30 }
 0x8a9   : > { %v1375_v36 = vpop.f32.mrf.mxu0  ;;  %v1378_v37 = vpop.f32.mrf.mxu1 }
 0x8aa   : > { %v1376_v38 = vadd.f32 %v1793_v35, %v1375_v36  ;;  %v1379_v40 = vadd.f32 %v1793_v35, %v1378_v37 }
 0x8ac   : > { %1381 = vst [vmem:[%s2192_s25] sm:$0xff] %v1376_v38 }
 0x8ad   : > { %1382 = vst [vmem:[%s2192_s25 + $0x8] sm:$0xff] %v1379_v40 }
 0x8ae PF: > { %s1640_s29 = sshll.u32 %s1934_s15, 4  ;;  %s2537_s18 = sld [smem:[#allocation30_spill]] }
 0x8af   : > { %s1396_s2 = sshll.u32 %s2192_s25, 4  ;;  %s2539_s30 = sand.u32 1, %s1910_s26   ;;  %s1397_s2 = int_to_ptr.vmem [resolvable:$true] %s1396_s2 }
 0x8b0   : > { %s1384_s27 = scalar_lea.sflag [#allocation5], %s2539_s30 }
 0x8b4   : > { %s2538_s0 = smov %s2537_s18  ;;  %s1395_s28 = scalar_lea.hbm %s2537_s18, %s1640_s29 }
 0x8b5   : > { %s1398_s19 = sshll.u32 %s1395_s28, 4  ;;  %s1844_s15 = scalar_lea.hbm %s2538_s0, 32  ;;  %s1399_s19 = int_to_ptr.hbm [resolvable:$true] %s1398_s19 }
 0x8b6   : > { %s1838_s11 = sshra.s32 %s1399_s19, 4  ;;  %s1839_s11 = int_to_ptr.hbm [resolvable:$true] %s1838_s11 }
 0x8b7   : > { %s1840_s12 = scalar_lea.hbm %s1839_s11, 16  ;;  %p1845_p1 = scmp.lt.s32.totalorder %s1839_s11, %s2538_s0 }
 0x8b8   : > { %p1841_p11 = scmp.ne.s32.totalorder %s1839_s11, %s1840_s12  ;;  %p1846_p4 = scmp.lt.s32.totalorder %s1844_s15, %s1840_s12 }
 0x8ba   : > { %p1842_p13 = pnand %p1841_p11, %p2115_p12  ;;  %p1847_p5 = por %p1846_p4, %p1845_p1 }
 0x8bc   : > { %p1843_p0 = pneg %p1842_p13 }
 0x8be   : > { %p1848_p6 = pnand %p1847_p5, %p1843_p0 }
 0x8c0   : > { %1851 = shalt.err (!%p1848_p6)
}
 0x8c1   : > { %s1955_s25 = smov 128   ;;  %s1956_s16 = smov 8  }
 0x8c2   : > { %1651 = dma.vmem_to_hbm [thread:$0]  (%p2115_p12), %s1397_s2, 256, %s1399_s19, %s1384_s27, %s1955_s25, %s1955_s25, %s1956_s16  }
 0x8c3 PF: > { %s2540_s21 = sld [smem:[#allocation15_spill]] }
 0x8c4   : > { %s2541_s1 = sld [smem:[#allocation9_spill]] }
 0x8c9   : > { %p1662_p7 = scmp.ge.s32.totalorder %s2540_s21, 2 }
 0x8ca   : > { %s1413_s29 = sand.u32 1, %s2541_s1  }
 0x8cb   : > { %p1658_p3 = pnand %p1662_p7, %p2123_p2  ;;  %s1414_s23 = scalar_lea.sflag [#allocation5], %s1413_s29 }
 0x8cd   : > { %p1659_p9 = pneg %p1658_p3 }
 0x8cf   : > { %1901 = dma.done.wait (%p1659_p9), %s1414_s23, 256  }
 0x8d0   : > { %1903 = vsyncadd (%p1659_p9), %s1414_s23, 4294967040  ;;  %s29_s18 = sadd.s32 1, %s2540_s21   ;;  %s2543_s6 = sld [smem:[#allocation10_spill]] }
 0x8d1   : > { %p26_p8 = scmp.ge.s32.totalorder %s29_s18, 6   ;;  %s2544_s27 = sld [smem:[#allocation19_spill]] }
 0x8d2   : > { %s2545_s28 = sld [smem:[#allocation11_spill]]  ;;  %s2552_s25 = smov %s1910_s26 }
 0x8d3   : > { %s2546_s29 = sld [smem:[#allocation12_spill]] }
 0x8d4   : > { %s2547_s30 = sld [smem:[#allocation18_spill]]  ;;  %28 = sbr.rel (!%p26_p8) target bundleno = 19 (0x13), region = 152 }
 0x8d5   : > { %s2548_s14 = sld [smem:[#allocation13_spill]] }
 0x8d6   : > { %s2549_s15 = sld [smem:[#allocation14_spill]]  ;;  %s2553_s26 = smov %s2543_s6 }
 0x8d7   : > { %s2550_s16 = sld [smem:[#allocation16_spill]] }
 0x8d8   : > { %s2551_s17 = sld [smem:[#allocation17_spill]] }
 0x8d9   :  { %1420 = vsyncpa [#allocation4], 1 }
 0x8da   :  { %1422 = vsyncpa [#allocation4 + $0x1], 1 }
 0x8db   :  { %1423 = vsyncpa [#allocation5], 1 }
 0x8dc   :  { %1425 = vsyncpa [#allocation5 + $0x1], 1 }

</bundles_post_ra>
